<compile_context>
chip_gen: v5e
topology: v5e:2x2
jax: 0.10.0
libtpu: 0.0.40
codegen_flags: <defaults>
</compile_context>

<pallas_src>
import functools

import jax
import jax.numpy as jnp
from jax.experimental import pallas as pl
from jax.experimental.pallas import tpu as pltpu

_LANE = 128


def _round_up(x, m):
    return (x + m - 1) // m * m


def _choose_th(h, cap=32):
    """Largest divisor of h (<= cap) that still gives >= 2 row strips when a
    reasonable (>= 4-row) strip exists; otherwise the whole image."""
    divisors = [d for d in range(1, h + 1) if h % d == 0]
    cand = [d for d in divisors if d <= cap]
    multi = [d for d in cand if h // d >= 2 and d >= 4]
    return max(multi) if multi else max(cand)


def _depthwise_dtype():
    """bf16 taps on v6e/v7x (bf16 VALU, half the DMA); f32 on v5e & older."""
    try:
        kind = jax.devices()[0].device_kind.lower()
    except Exception:
        return jnp.float32
    if any(tag in kind for tag in ("v6", "v7", "7x")):
        return jnp.bfloat16
    return jnp.float32


def _dsconv_kernel(xc_ref, xt_ref, xb_ref, wdw_ref, b1_ref, wpw_ref, b2_ref,
                   out_ref, *, TH, W, C, TCO):
    # xc_ref : (TH, W+2, C)   current row strip (W already carries 1-px halo)
    # xt_ref : (1,  W+2, C)   row just above the strip (clamped at the border)
    # xb_ref : (1,  W+2, C)   row just below the strip (clamped at the border)
    # wdw_ref: (3, 3, C)      depthwise 3x3 weights, BN1 scale pre-folded
    # b1_ref : (1, C)         folded BN1 bias
    # wpw_ref: (C, TCO) bf16  pointwise weight (BN2 scale pre-folded), resident
    # b2_ref : (1, TCO) f32   folded BN2 bias
    # out_ref: (TH, W, TCO)
    ih = pl.program_id(1)
    nh = pl.num_programs(1)
    cd = xc_ref.dtype

    # padding=1 along H: the halo rows are zero at the image borders.
    top_valid = (ih > 0).astype(cd)
    bot_valid = (ih < nh - 1).astype(cd)

    xc = xc_ref[...]                   # (TH, W+2, C)
    xt = xt_ref[...] * top_valid       # (1, W+2, C), zero at the top border
    xb = xb_ref[...] * bot_valid       # (1, W+2, C), zero at the bottom border
    wdw = wdw_ref[...]                 # (3, 3, C)
    b1 = b1_ref[0]                     # (C,)
    wpw = wpw_ref[...]                 # (C, TCO) bf16
    b2 = b2_ref[0]                     # (TCO,) f32
    zero = jnp.zeros((), cd)

    # Hoist the 9 per-channel tap weights once (reused by all three row blocks).
    w_tap = [[wdw[dy, dx] for dx in range(3)] for dy in range(3)]

    def taps(r_up, r_mid, r_dn):
        # r_* : (R, W+2, C) -> (R, W, C); 9 shifted FMAs on the VPU.
        # NOTE: the dx=1,2 slices are sublane-misaligned; if the bundle dump
        # shows relayout copies, switch to pltpu.roll(..., axis=1) + slice 0.
        rows = (r_up, r_mid, r_dn)
        acc = rows[0][:, 0:W, :] * w_tap[0][0]
        for dy in range(3):
            for dx in range(3):
                if dy == 0 and dx == 0:
                    continue
                acc = acc + rows[dy][:, dx:dx + W, :] * w_tap[dy][dx]
        return acc

    def pointwise(dw, rows):
        # (rows*W, C) @ (C, TCO) on the MXU: bf16 operands, f32 accumulation.
        pw = jnp.dot(dw.reshape(rows * W, C).astype(jnp.bfloat16), wpw,
                     preferred_element_type=jnp.float32)
        y = jnp.maximum(pw + b2, 0.0)
        return y.reshape(rows, W, TCO).astype(out_ref.dtype)

    # Interior output rows 1..TH-2: every tap comes from the current strip.
    dw_mid = jnp.maximum(taps(xc[0:TH - 2], xc[1:TH - 1], xc[2:TH]) + b1, zero)
    out_ref[1:TH - 1] = pointwise(dw_mid, TH - 2)

    # First / last output rows additionally use the (masked) halo rows.
    dw_top = jnp.maximum(taps(xt, xc[0:1], xc[1:2]) + b1, zero)
    out_ref[0:1] = pointwise(dw_top, 1)

    dw_bot = jnp.maximum(taps(xc[TH - 2:TH - 1], xc[TH - 1:TH], xb) + b1, zero)
    out_ref[TH - 1:TH] = pointwise(dw_bot, 1)


def dsconv_pallas_nhwc(x_nhwc, wdw_hwc, scale1, bias1, wpw, scale2, bias2,
                       stride=1, dw_dtype=None):
    """Fused DSConv forward on NHWC input; returns NHWC output (f32)."""
    if stride != 1:
        raise NotImplementedError("stride>1 not implemented")  # TODO(synk)

    N, H, W, Cin = x_nhwc.shape
    Cout = wpw.shape[1]
    if H < 3:
        raise NotImplementedError("H < 3 not supported")  # TODO(synk)

    if dw_dtype is None:
        dw_dtype = _depthwise_dtype()

    # Lane-dense channel padding (no-op when channels are already 128-aligned).
    Cin_p = _round_up(Cin, _LANE)
    Cout_p = _round_up(Cout, _LANE)

    # One fused pad: 1-px W halo + channel pad, stored in the depthwise
    # compute dtype (bf16 on v6e/v7x halves the activation DMA).
    # TODO(synk): fold this pad into the kernel (masked edge taps) to avoid the
    #             extra HBM pass over the activation.
    x_p = jnp.pad(x_nhwc.astype(jnp.float32),
                  ((0, 0), (0, 0), (1, 1), (0, Cin_p - Cin))).astype(dw_dtype)

    # Fold the BatchNorm scales into the conv weights.
    wdw_f = jnp.pad((wdw_hwc * scale1[None, None, :]).astype(jnp.float32),
                    ((0, 0), (0, 0), (0, Cin_p - Cin))).astype(dw_dtype)
    b1_f = jnp.pad(bias1.astype(jnp.float32),
                   (0, Cin_p - Cin)).reshape(1, Cin_p).astype(dw_dtype)
    wpw_bf = jnp.pad((wpw * scale2[None, :]).astype(jnp.float32),
                     ((0, Cin_p - Cin), (0, Cout_p - Cout))).astype(jnp.bfloat16)
    b2_f = jnp.pad(bias2.astype(jnp.float32),
                   (0, Cout_p - Cout)).reshape(1, Cout_p)

    # Row-strip tiling: divisor of H (<= 32) with >= 2 strips when possible.
    TH = _choose_th(H)
    if TH < 3:
        TH = H
    n_h = H // TH

    # Full-width Cout tile for MobileNet-scale layers (Cout_p <= 1024 ->
    # <= 2 MiB bf16): weight fetched once, stays resident, no depthwise
    # recompute across Cout tiles, widest lane-dense output store.
    if Cout_p <= 1024:
        TCO = Cout_p
    elif Cout_p % 256 == 0:
        TCO = 256
    else:
        TCO = _LANE
    n_co = Cout_p // TCO

    kernel = functools.partial(_dsconv_kernel, TH=TH, W=W, C=Cin_p, TCO=TCO)

    x_item = jnp.dtype(dw_dtype).itemsize
    flops = 2 * N * H * W * Cin_p * (Cout_p + 9)
    bytes_accessed = (
        n_co * N * n_h * (TH + 2) * (W + 2) * Cin_p * x_item   # strips + halo
        + N * H * W * Cout_p * 4                               # output
        + wpw_bf.size * 2 + wdw_f.size * x_item                # resident weights
        + b1_f.size * x_item + b2_f.size * 4)

    out_p = pl.pallas_call(
        kernel,
        out_shape=jax.ShapeDtypeStruct((N, H, W, Cout_p), jnp.float32),
        grid_spec=pltpu.PrefetchScalarGridSpec(
            num_scalar_prefetch=0,
            grid=(N, n_h, n_co),
            in_specs=[
                # current row strip
                pl.BlockSpec((None, TH, W + 2, Cin_p),
                             lambda n, i, co: (n, i, 0, 0)),
                # 1-row halos above / below (clamped; zero-masked in-kernel)
                pl.BlockSpec((None, 1, W + 2, Cin_p),
                             lambda n, i, co:
                             (n, jnp.maximum(i * TH - 1, 0), 0, 0)),
                pl.BlockSpec((None, 1, W + 2, Cin_p),
                             lambda n, i, co:
                             (n, jnp.minimum((i + 1) * TH, H - 1), 0, 0)),
                pl.BlockSpec((3, 3, Cin_p), lambda n, i, co: (0, 0, 0)),
                pl.BlockSpec((1, Cin_p), lambda n, i, co: (0, 0)),
                pl.BlockSpec((Cin_p, TCO), lambda n, i, co: (0, co)),
                pl.BlockSpec((1, TCO), lambda n, i, co: (0, co)),
            ],
            out_specs=pl.BlockSpec((None, TH, W, TCO),
                                   lambda n, i, co: (n, i, 0, co)),
        ),
        compiler_params=pltpu.CompilerParams(
            dimension_semantics=("parallel", "parallel", "parallel"),
            vmem_limit_bytes=32 * 1024 * 1024),
        cost_estimate=pl.CostEstimate(flops=flops, transcendentals=0,
                                      bytes_accessed=bytes_accessed),
    )(x_p, x_p, x_p, wdw_f, b1_f, wpw_bf, b2_f)

    return out_p[..., :Cout]


def dsconv_pallas(x_nchw, wdw_hwc, scale1, bias1, wpw, scale2, bias2,
                  stride=1):
    """PyTorch-layout (NCHW) wrapper.  A real NHWC pipeline should call
    dsconv_pallas_nhwc directly and skip both layout transposes."""
    x_nhwc = jnp.transpose(x_nchw, (0, 2, 3, 1))
    out_nhwc = dsconv_pallas_nhwc(x_nhwc, wdw_hwc, scale1, bias1, wpw,
                                  scale2, bias2, stride=stride)
    return jnp.transpose(out_nhwc, (0, 3, 1, 2))


def dsconv_reference(x_nchw, wdw_hwc, scale1, bias1, wpw, scale2, bias2):
    """Pure-JAX f32 reference (same folded-BN semantics)."""
    x = jnp.transpose(x_nchw, (0, 2, 3, 1)).astype(jnp.float32)
    N, H, W, C = x.shape
    xp = jnp.pad(x, ((0, 0), (1, 1), (1, 1), (0, 0)))
    acc = jnp.zeros_like(x)
    for dy in range(3):
        for dx in range(3):
            acc = acc + xp[:, dy:dy + H, dx:dx + W, :] * wdw_hwc[dy, dx, :]
    dw = jnp.maximum(acc * scale1 + bias1, 0.0)
    pw = jnp.einsum("nhwc,co->nhwo", dw, wpw)
    y = jnp.maximum(pw * scale2 + bias2, 0.0)
    return jnp.transpose(y, (0, 3, 1, 2))


def make_params(key, cin, cout, eps=1e-5):
    ks = jax.random.split(key, 10)
    # PyTorch shapes: depthwise weight (Cin,1,3,3); pointwise (Cout,Cin,1,1).
    w_dw = jax.random.normal(ks[0], (cin, 1, 3, 3), jnp.float32) * 0.1
    w_pw = jax.random.normal(ks[1], (cout, cin, 1, 1), jnp.float32) * 0.1
    # BatchNorm parameters (eval mode: running stats).
    g1 = jax.random.uniform(ks[2], (cin,), jnp.float32, 0.5, 1.5)
    b1 = jax.random.normal(ks[3], (cin,), jnp.float32) * 0.1
    m1 = jax.random.normal(ks[4], (cin,), jnp.float32) * 0.1
    v1 = jax.random.uniform(ks[5], (cin,), jnp.float32, 0.5, 1.5)
    g2 = jax.random.uniform(ks[6], (cout,), jnp.float32, 0.5, 1.5)
    b2 = jax.random.normal(ks[7], (cout,), jnp.float32) * 0.1
    m2 = jax.random.normal(ks[8], (cout,), jnp.float32) * 0.1
    v2 = jax.random.uniform(ks[9], (cout,), jnp.float32, 0.5, 1.5)

    wdw_hwc = jnp.transpose(w_dw[:, 0], (1, 2, 0))        # (3, 3, Cin)
    wpw = jnp.transpose(w_pw[:, :, 0, 0], (1, 0))         # (Cin, Cout)
    s1 = g1 / jnp.sqrt(v1 + eps)
    bb1 = b1 - m1 * s1
    s2 = g2 / jnp.sqrt(v2 + eps)
    bb2 = b2 - m2 * s2
    return wdw_hwc, s1, bb1, wpw, s2, bb2


if __name__ == "__main__":
    key = jax.random.PRNGKey(0)
    k_x, k_p = jax.random.split(key)

    # First DSConv of MobileNetV1 is DSConv(32, 64); small spatial for demo.
    N, Cin, Cout, H, W = 2, 32, 64, 16, 16
    x = jax.random.normal(k_x, (N, Cin, H, W), jnp.float32)
    params = make_params(k_p, Cin, Cout)

    out = dsconv_pallas(x, *params)
    out = jax.block_until_ready(out)

    ref = dsconv_reference(x, *params)
    assert out.shape == (N, Cout, H, W), out.shape
    # Tolerance accounts for bf16 MXU operands (and bf16 depthwise taps on
    # v6e/v7x) with f32 accumulation in-kernel.
    err = float(jnp.max(jnp.abs(out - ref)))
    assert jnp.allclose(out, ref, atol=2e-2, rtol=2e-2), err
    print("KERNEL_OK")
</pallas_src>

<mosaic_0001>
module attributes {stable_mosaic.version = 11 : i64} {
  func.func @_dsconv_kernel(%arg0: i32, %arg1: i32, %arg2: i32, %arg3: memref<1x8x18x128xf32, #tpu.memory_space<vmem>>, %arg4: memref<1x1x18x128xf32, #tpu.memory_space<vmem>>, %arg5: memref<1x1x18x128xf32, #tpu.memory_space<vmem>>, %arg6: memref<3x3x128xf32, #tpu.memory_space<vmem>>, %arg7: memref<1x128xf32, #tpu.memory_space<vmem>>, %arg8: memref<128x128xbf16, #tpu.memory_space<vmem>>, %arg9: memref<1x128xf32, #tpu.memory_space<vmem>>, %arg10: memref<1x8x16x128xf32, #tpu.memory_space<vmem>>) attributes {dimension_semantics = [#tpu.dimension_semantics<parallel>, #tpu.dimension_semantics<parallel>, #tpu.dimension_semantics<parallel>], iteration_bounds = array<i64: 2, 2, 1>, scalar_prefetch = 0 : i64, scratch_operands = 0 : i64, tpu.core_type = #tpu.core_type<tc>, window_params = [{transform_indices = @transform_0, window_bounds = array<i64: 1, 8, 18, 128>}, {transform_indices = @transform_1, window_bounds = array<i64: 1, 1, 18, 128>}, {transform_indices = @transform_2, window_bounds = array<i64: 1, 1, 18, 128>}, {pipeline_mode = #tpu.pipeline_mode<synchronous>, transform_indices = @transform_3, window_bounds = array<i64: 3, 3, 128>}, {pipeline_mode = #tpu.pipeline_mode<synchronous>, transform_indices = @transform_4, window_bounds = array<i64: 1, 128>}, {transform_indices = @transform_5, window_bounds = array<i64: 128, 128>}, {transform_indices = @transform_6, window_bounds = array<i64: 1, 128>}, {transform_indices = @transform_7, window_bounds = array<i64: 1, 8, 16, 128>}]} {
    %c0_i32 = arith.constant 0 : i32
    %0 = arith.cmpi sgt, %arg1, %c0_i32 : i32
    %1 = arith.extui %0 : i1 to i32
    %2 = arith.sitofp %1 : i32 to f32
    %c1_i32 = arith.constant 1 : i32
    %3 = arith.cmpi slt, %arg1, %c1_i32 : i32
    %4 = arith.extui %3 : i1 to i32
    %5 = arith.sitofp %4 : i32 to f32
    %c0 = arith.constant 0 : index
    %c0_0 = arith.constant 0 : index
    %c0_1 = arith.constant 0 : index
    %c0_2 = arith.constant 0 : index
    %6 = vector.load %arg3[%c0, %c0_0, %c0_1, %c0_2] : memref<1x8x18x128xf32, #tpu.memory_space<vmem>>, vector<1x8x18x128xf32>
    %7 = vector.shape_cast %6 : vector<1x8x18x128xf32> to vector<8x18x128xf32>
    %c0_3 = arith.constant 0 : index
    %c0_4 = arith.constant 0 : index
    %c0_5 = arith.constant 0 : index
    %c0_6 = arith.constant 0 : index
    %8 = vector.load %arg4[%c0_3, %c0_4, %c0_5, %c0_6] : memref<1x1x18x128xf32, #tpu.memory_space<vmem>>, vector<1x1x18x128xf32>
    %9 = vector.shape_cast %8 : vector<1x1x18x128xf32> to vector<1x18x128xf32>
    %10 = vector.broadcast %2 : f32 to vector<1x18x128xf32>
    %11 = arith.mulf %9, %10 : vector<1x18x128xf32>
    %c0_7 = arith.constant 0 : index
    %c0_8 = arith.constant 0 : index
    %c0_9 = arith.constant 0 : index
    %c0_10 = arith.constant 0 : index
    %12 = vector.load %arg5[%c0_7, %c0_8, %c0_9, %c0_10] : memref<1x1x18x128xf32, #tpu.memory_space<vmem>>, vector<1x1x18x128xf32>
    %13 = vector.shape_cast %12 : vector<1x1x18x128xf32> to vector<1x18x128xf32>
    %14 = vector.broadcast %5 : f32 to vector<1x18x128xf32>
    %15 = arith.mulf %13, %14 : vector<1x18x128xf32>
    %c0_11 = arith.constant 0 : index
    %c0_12 = arith.constant 0 : index
    %c0_13 = arith.constant 0 : index
    %16 = vector.load %arg6[%c0_11, %c0_12, %c0_13] : memref<3x3x128xf32, #tpu.memory_space<vmem>>, vector<3x3x128xf32>
    %c0_14 = arith.constant 0 : index
    %c0_15 = arith.constant 0 : index
    %17 = vector.load %arg7[%c0_14, %c0_15] : memref<1x128xf32, #tpu.memory_space<vmem>>, vector<1x128xf32>
    %18 = vector.shape_cast %17 : vector<1x128xf32> to vector<128xf32>
    %c0_16 = arith.constant 0 : index
    %c0_17 = arith.constant 0 : index
    %19 = vector.load %arg8[%c0_16, %c0_17] : memref<128x128xbf16, #tpu.memory_space<vmem>>, vector<128x128xbf16>
    %c0_18 = arith.constant 0 : index
    %c0_19 = arith.constant 0 : index
    %20 = vector.load %arg9[%c0_18, %c0_19] : memref<1x128xf32, #tpu.memory_space<vmem>>, vector<1x128xf32>
    %21 = vector.shape_cast %20 : vector<1x128xf32> to vector<128xf32>
    %22 = vector.extract_strided_slice %16 {offsets = [0, 0, 0], sizes = [1, 1, 128], strides = [1, 1, 1]} : vector<3x3x128xf32> to vector<1x1x128xf32>
    %23 = vector.shape_cast %22 : vector<1x1x128xf32> to vector<128xf32>
    %24 = vector.extract_strided_slice %16 {offsets = [0, 1, 0], sizes = [1, 1, 128], strides = [1, 1, 1]} : vector<3x3x128xf32> to vector<1x1x128xf32>
    %25 = vector.shape_cast %24 : vector<1x1x128xf32> to vector<128xf32>
    %26 = vector.extract_strided_slice %16 {offsets = [0, 2, 0], sizes = [1, 1, 128], strides = [1, 1, 1]} : vector<3x3x128xf32> to vector<1x1x128xf32>
    %27 = vector.shape_cast %26 : vector<1x1x128xf32> to vector<128xf32>
    %28 = vector.extract_strided_slice %16 {offsets = [1, 0, 0], sizes = [1, 1, 128], strides = [1, 1, 1]} : vector<3x3x128xf32> to vector<1x1x128xf32>
    %29 = vector.shape_cast %28 : vector<1x1x128xf32> to vector<128xf32>
    %30 = vector.extract_strided_slice %16 {offsets = [1, 1, 0], sizes = [1, 1, 128], strides = [1, 1, 1]} : vector<3x3x128xf32> to vector<1x1x128xf32>
    %31 = vector.shape_cast %30 : vector<1x1x128xf32> to vector<128xf32>
    %32 = vector.extract_strided_slice %16 {offsets = [1, 2, 0], sizes = [1, 1, 128], strides = [1, 1, 1]} : vector<3x3x128xf32> to vector<1x1x128xf32>
    %33 = vector.shape_cast %32 : vector<1x1x128xf32> to vector<128xf32>
    %34 = vector.extract_strided_slice %16 {offsets = [2, 0, 0], sizes = [1, 1, 128], strides = [1, 1, 1]} : vector<3x3x128xf32> to vector<1x1x128xf32>
    %35 = vector.shape_cast %34 : vector<1x1x128xf32> to vector<128xf32>
    %36 = vector.extract_strided_slice %16 {offsets = [2, 1, 0], sizes = [1, 1, 128], strides = [1, 1, 1]} : vector<3x3x128xf32> to vector<1x1x128xf32>
    %37 = vector.shape_cast %36 : vector<1x1x128xf32> to vector<128xf32>
    %38 = vector.extract_strided_slice %16 {offsets = [2, 2, 0], sizes = [1, 1, 128], strides = [1, 1, 1]} : vector<3x3x128xf32> to vector<1x1x128xf32>
    %39 = vector.shape_cast %38 : vector<1x1x128xf32> to vector<128xf32>
    %40 = vector.extract_strided_slice %7 {offsets = [0, 0, 0], sizes = [6, 18, 128], strides = [1, 1, 1]} : vector<8x18x128xf32> to vector<6x18x128xf32>
    %41 = vector.extract_strided_slice %7 {offsets = [1, 0, 0], sizes = [6, 18, 128], strides = [1, 1, 1]} : vector<8x18x128xf32> to vector<6x18x128xf32>
    %42 = vector.extract_strided_slice %7 {offsets = [2, 0, 0], sizes = [6, 18, 128], strides = [1, 1, 1]} : vector<8x18x128xf32> to vector<6x18x128xf32>
    %43 = vector.extract_strided_slice %40 {offsets = [0, 0, 0], sizes = [6, 16, 128], strides = [1, 1, 1]} : vector<6x18x128xf32> to vector<6x16x128xf32>
    %44 = vector.shape_cast %23 : vector<128xf32> to vector<1x1x128xf32>
    %45 = vector.broadcast %44 : vector<1x1x128xf32> to vector<6x16x128xf32>
    %46 = arith.mulf %43, %45 : vector<6x16x128xf32>
    %47 = vector.extract_strided_slice %40 {offsets = [0, 1, 0], sizes = [6, 16, 128], strides = [1, 1, 1]} : vector<6x18x128xf32> to vector<6x16x128xf32>
    %48 = vector.shape_cast %25 : vector<128xf32> to vector<1x1x128xf32>
    %49 = vector.broadcast %48 : vector<1x1x128xf32> to vector<6x16x128xf32>
    %50 = arith.mulf %47, %49 : vector<6x16x128xf32>
    %51 = arith.addf %46, %50 : vector<6x16x128xf32>
    %52 = vector.extract_strided_slice %40 {offsets = [0, 2, 0], sizes = [6, 16, 128], strides = [1, 1, 1]} : vector<6x18x128xf32> to vector<6x16x128xf32>
    %53 = vector.shape_cast %27 : vector<128xf32> to vector<1x1x128xf32>
    %54 = vector.broadcast %53 : vector<1x1x128xf32> to vector<6x16x128xf32>
    %55 = arith.mulf %52, %54 : vector<6x16x128xf32>
    %56 = arith.addf %51, %55 : vector<6x16x128xf32>
    %57 = vector.extract_strided_slice %41 {offsets = [0, 0, 0], sizes = [6, 16, 128], strides = [1, 1, 1]} : vector<6x18x128xf32> to vector<6x16x128xf32>
    %58 = vector.shape_cast %29 : vector<128xf32> to vector<1x1x128xf32>
    %59 = vector.broadcast %58 : vector<1x1x128xf32> to vector<6x16x128xf32>
    %60 = arith.mulf %57, %59 : vector<6x16x128xf32>
    %61 = arith.addf %56, %60 : vector<6x16x128xf32>
    %62 = vector.extract_strided_slice %41 {offsets = [0, 1, 0], sizes = [6, 16, 128], strides = [1, 1, 1]} : vector<6x18x128xf32> to vector<6x16x128xf32>
    %63 = vector.shape_cast %31 : vector<128xf32> to vector<1x1x128xf32>
    %64 = vector.broadcast %63 : vector<1x1x128xf32> to vector<6x16x128xf32>
    %65 = arith.mulf %62, %64 : vector<6x16x128xf32>
    %66 = arith.addf %61, %65 : vector<6x16x128xf32>
    %67 = vector.extract_strided_slice %41 {offsets = [0, 2, 0], sizes = [6, 16, 128], strides = [1, 1, 1]} : vector<6x18x128xf32> to vector<6x16x128xf32>
    %68 = vector.shape_cast %33 : vector<128xf32> to vector<1x1x128xf32>
    %69 = vector.broadcast %68 : vector<1x1x128xf32> to vector<6x16x128xf32>
    %70 = arith.mulf %67, %69 : vector<6x16x128xf32>
    %71 = arith.addf %66, %70 : vector<6x16x128xf32>
    %72 = vector.extract_strided_slice %42 {offsets = [0, 0, 0], sizes = [6, 16, 128], strides = [1, 1, 1]} : vector<6x18x128xf32> to vector<6x16x128xf32>
    %73 = vector.shape_cast %35 : vector<128xf32> to vector<1x1x128xf32>
    %74 = vector.broadcast %73 : vector<1x1x128xf32> to vector<6x16x128xf32>
    %75 = arith.mulf %72, %74 : vector<6x16x128xf32>
    %76 = arith.addf %71, %75 : vector<6x16x128xf32>
    %77 = vector.extract_strided_slice %42 {offsets = [0, 1, 0], sizes = [6, 16, 128], strides = [1, 1, 1]} : vector<6x18x128xf32> to vector<6x16x128xf32>
    %78 = vector.shape_cast %37 : vector<128xf32> to vector<1x1x128xf32>
    %79 = vector.broadcast %78 : vector<1x1x128xf32> to vector<6x16x128xf32>
    %80 = arith.mulf %77, %79 : vector<6x16x128xf32>
    %81 = arith.addf %76, %80 : vector<6x16x128xf32>
    %82 = vector.extract_strided_slice %42 {offsets = [0, 2, 0], sizes = [6, 16, 128], strides = [1, 1, 1]} : vector<6x18x128xf32> to vector<6x16x128xf32>
    %83 = vector.shape_cast %39 : vector<128xf32> to vector<1x1x128xf32>
    %84 = vector.broadcast %83 : vector<1x1x128xf32> to vector<6x16x128xf32>
    %85 = arith.mulf %82, %84 : vector<6x16x128xf32>
    %86 = arith.addf %81, %85 : vector<6x16x128xf32>
    %87 = vector.shape_cast %18 : vector<128xf32> to vector<1x1x128xf32>
    %88 = vector.broadcast %87 : vector<1x1x128xf32> to vector<6x16x128xf32>
    %89 = arith.addf %86, %88 : vector<6x16x128xf32>
    %cst = arith.constant 0.000000e+00 : f32
    %90 = vector.broadcast %cst : f32 to vector<6x16x128xf32>
    %91 = arith.maximumf %89, %90 : vector<6x16x128xf32>
    %92 = vector.shape_cast %91 : vector<6x16x128xf32> to vector<96x128xf32>
    %93 = arith.truncf %92 : vector<96x128xf32> to vector<96x128xbf16>
    %cst_20 = arith.constant dense<0.000000e+00> : vector<96x128xf32>
    %94 = tpu.matmul %93, %19, %cst_20 {dimension_numbers = #tpu.dot_dimension_numbers<[1], [0], [0], [1], [0, 0, 1, 1], [], []>} : vector<96x128xbf16>, vector<128x128xbf16>, vector<96x128xf32> -> vector<96x128xf32>
    %95 = vector.shape_cast %21 : vector<128xf32> to vector<1x128xf32>
    %96 = vector.broadcast %95 : vector<1x128xf32> to vector<96x128xf32>
    %97 = arith.addf %94, %96 : vector<96x128xf32>
    %cst_21 = arith.constant 0.000000e+00 : f32
    %98 = vector.broadcast %cst_21 : f32 to vector<96x128xf32>
    %99 = arith.maximumf %97, %98 : vector<96x128xf32>
    %100 = vector.shape_cast %99 : vector<96x128xf32> to vector<6x16x128xf32>
    %c0_22 = arith.constant 0 : index
    %c1 = arith.constant 1 : index
    %c0_23 = arith.constant 0 : index
    %c0_24 = arith.constant 0 : index
    %101 = vector.load %arg10[%c0_22, %c1, %c0_23, %c0_24] : memref<1x8x16x128xf32, #tpu.memory_space<vmem>>, vector<1x6x16x128xf32>
    %102 = vector.shape_cast %101 : vector<1x6x16x128xf32> to vector<6x16x128xf32>
    %103 = vector.shape_cast %100 : vector<6x16x128xf32> to vector<1x6x16x128xf32>
    tpu.vector_store %arg10[%c0_22, %c1, %c0_23, %c0_24], %103 {strides = array<i32>} : memref<1x8x16x128xf32, #tpu.memory_space<vmem>>, vector<1x6x16x128xf32>,
    %104 = vector.extract_strided_slice %7 {offsets = [0, 0, 0], sizes = [1, 18, 128], strides = [1, 1, 1]} : vector<8x18x128xf32> to vector<1x18x128xf32>
    %105 = vector.extract_strided_slice %7 {offsets = [1, 0, 0], sizes = [1, 18, 128], strides = [1, 1, 1]} : vector<8x18x128xf32> to vector<1x18x128xf32>
    %106 = vector.extract_strided_slice %11 {offsets = [0, 0, 0], sizes = [1, 16, 128], strides = [1, 1, 1]} : vector<1x18x128xf32> to vector<1x16x128xf32>
    %107 = vector.shape_cast %23 : vector<128xf32> to vector<1x1x128xf32>
    %108 = vector.broadcast %107 : vector<1x1x128xf32> to vector<1x16x128xf32>
    %109 = arith.mulf %106, %108 : vector<1x16x128xf32>
    %110 = vector.extract_strided_slice %11 {offsets = [0, 1, 0], sizes = [1, 16, 128], strides = [1, 1, 1]} : vector<1x18x128xf32> to vector<1x16x128xf32>
    %111 = vector.shape_cast %25 : vector<128xf32> to vector<1x1x128xf32>
    %112 = vector.broadcast %111 : vector<1x1x128xf32> to vector<1x16x128xf32>
    %113 = arith.mulf %110, %112 : vector<1x16x128xf32>
    %114 = arith.addf %109, %113 : vector<1x16x128xf32>
    %115 = vector.extract_strided_slice %11 {offsets = [0, 2, 0], sizes = [1, 16, 128], strides = [1, 1, 1]} : vector<1x18x128xf32> to vector<1x16x128xf32>
    %116 = vector.shape_cast %27 : vector<128xf32> to vector<1x1x128xf32>
    %117 = vector.broadcast %116 : vector<1x1x128xf32> to vector<1x16x128xf32>
    %118 = arith.mulf %115, %117 : vector<1x16x128xf32>
    %119 = arith.addf %114, %118 : vector<1x16x128xf32>
    %120 = vector.extract_strided_slice %104 {offsets = [0, 0, 0], sizes = [1, 16, 128], strides = [1, 1, 1]} : vector<1x18x128xf32> to vector<1x16x128xf32>
    %121 = vector.shape_cast %29 : vector<128xf32> to vector<1x1x128xf32>
    %122 = vector.broadcast %121 : vector<1x1x128xf32> to vector<1x16x128xf32>
    %123 = arith.mulf %120, %122 : vector<1x16x128xf32>
    %124 = arith.addf %119, %123 : vector<1x16x128xf32>
    %125 = vector.extract_strided_slice %104 {offsets = [0, 1, 0], sizes = [1, 16, 128], strides = [1, 1, 1]} : vector<1x18x128xf32> to vector<1x16x128xf32>
    %126 = vector.shape_cast %31 : vector<128xf32> to vector<1x1x128xf32>
    %127 = vector.broadcast %126 : vector<1x1x128xf32> to vector<1x16x128xf32>
    %128 = arith.mulf %125, %127 : vector<1x16x128xf32>
    %129 = arith.addf %124, %128 : vector<1x16x128xf32>
    %130 = vector.extract_strided_slice %104 {offsets = [0, 2, 0], sizes = [1, 16, 128], strides = [1, 1, 1]} : vector<1x18x128xf32> to vector<1x16x128xf32>
    %131 = vector.shape_cast %33 : vector<128xf32> to vector<1x1x128xf32>
    %132 = vector.broadcast %131 : vector<1x1x128xf32> to vector<1x16x128xf32>
    %133 = arith.mulf %130, %132 : vector<1x16x128xf32>
    %134 = arith.addf %129, %133 : vector<1x16x128xf32>
    %135 = vector.extract_strided_slice %105 {offsets = [0, 0, 0], sizes = [1, 16, 128], strides = [1, 1, 1]} : vector<1x18x128xf32> to vector<1x16x128xf32>
    %136 = vector.shape_cast %35 : vector<128xf32> to vector<1x1x128xf32>
    %137 = vector.broadcast %136 : vector<1x1x128xf32> to vector<1x16x128xf32>
    %138 = arith.mulf %135, %137 : vector<1x16x128xf32>
    %139 = arith.addf %134, %138 : vector<1x16x128xf32>
    %140 = vector.extract_strided_slice %105 {offsets = [0, 1, 0], sizes = [1, 16, 128], strides = [1, 1, 1]} : vector<1x18x128xf32> to vector<1x16x128xf32>
    %141 = vector.shape_cast %37 : vector<128xf32> to vector<1x1x128xf32>
    %142 = vector.broadcast %141 : vector<1x1x128xf32> to vector<1x16x128xf32>
    %143 = arith.mulf %140, %142 : vector<1x16x128xf32>
    %144 = arith.addf %139, %143 : vector<1x16x128xf32>
    %145 = vector.extract_strided_slice %105 {offsets = [0, 2, 0], sizes = [1, 16, 128], strides = [1, 1, 1]} : vector<1x18x128xf32> to vector<1x16x128xf32>
    %146 = vector.shape_cast %39 : vector<128xf32> to vector<1x1x128xf32>
    %147 = vector.broadcast %146 : vector<1x1x128xf32> to vector<1x16x128xf32>
    %148 = arith.mulf %145, %147 : vector<1x16x128xf32>
    %149 = arith.addf %144, %148 : vector<1x16x128xf32>
    %150 = vector.shape_cast %18 : vector<128xf32> to vector<1x1x128xf32>
    %151 = vector.broadcast %150 : vector<1x1x128xf32> to vector<1x16x128xf32>
    %152 = arith.addf %149, %151 : vector<1x16x128xf32>
    %cst_25 = arith.constant 0.000000e+00 : f32
    %153 = vector.broadcast %cst_25 : f32 to vector<1x16x128xf32>
    %154 = arith.maximumf %152, %153 : vector<1x16x128xf32>
    %155 = vector.shape_cast %154 : vector<1x16x128xf32> to vector<16x128xf32>
    %156 = arith.truncf %155 : vector<16x128xf32> to vector<16x128xbf16>
    %cst_26 = arith.constant dense<0.000000e+00> : vector<16x128xf32>
    %157 = tpu.matmul %156, %19, %cst_26 {dimension_numbers = #tpu.dot_dimension_numbers<[1], [0], [0], [1], [0, 0, 1, 1], [], []>} : vector<16x128xbf16>, vector<128x128xbf16>, vector<16x128xf32> -> vector<16x128xf32>
    %158 = vector.shape_cast %21 : vector<128xf32> to vector<1x128xf32>
    %159 = vector.broadcast %158 : vector<1x128xf32> to vector<16x128xf32>
    %160 = arith.addf %157, %159 : vector<16x128xf32>
    %cst_27 = arith.constant 0.000000e+00 : f32
    %161 = vector.broadcast %cst_27 : f32 to vector<16x128xf32>
    %162 = arith.maximumf %160, %161 : vector<16x128xf32>
    %163 = vector.shape_cast %162 : vector<16x128xf32> to vector<1x16x128xf32>
    %c0_28 = arith.constant 0 : index
    %c0_29 = arith.constant 0 : index
    %c0_30 = arith.constant 0 : index
    %c0_31 = arith.constant 0 : index
    %164 = vector.load %arg10[%c0_28, %c0_29, %c0_30, %c0_31] : memref<1x8x16x128xf32, #tpu.memory_space<vmem>>, vector<1x1x16x128xf32>
    %165 = vector.shape_cast %164 : vector<1x1x16x128xf32> to vector<1x16x128xf32>
    %166 = vector.shape_cast %163 : vector<1x16x128xf32> to vector<1x1x16x128xf32>
    tpu.vector_store %arg10[%c0_28, %c0_29, %c0_30, %c0_31], %166 {strides = array<i32>} : memref<1x8x16x128xf32, #tpu.memory_space<vmem>>, vector<1x1x16x128xf32>,
    %167 = vector.extract_strided_slice %7 {offsets = [6, 0, 0], sizes = [1, 18, 128], strides = [1, 1, 1]} : vector<8x18x128xf32> to vector<1x18x128xf32>
    %168 = vector.extract_strided_slice %7 {offsets = [7, 0, 0], sizes = [1, 18, 128], strides = [1, 1, 1]} : vector<8x18x128xf32> to vector<1x18x128xf32>
    %169 = vector.extract_strided_slice %167 {offsets = [0, 0, 0], sizes = [1, 16, 128], strides = [1, 1, 1]} : vector<1x18x128xf32> to vector<1x16x128xf32>
    %170 = vector.shape_cast %23 : vector<128xf32> to vector<1x1x128xf32>
    %171 = vector.broadcast %170 : vector<1x1x128xf32> to vector<1x16x128xf32>
    %172 = arith.mulf %169, %171 : vector<1x16x128xf32>
    %173 = vector.extract_strided_slice %167 {offsets = [0, 1, 0], sizes = [1, 16, 128], strides = [1, 1, 1]} : vector<1x18x128xf32> to vector<1x16x128xf32>
    %174 = vector.shape_cast %25 : vector<128xf32> to vector<1x1x128xf32>
    %175 = vector.broadcast %174 : vector<1x1x128xf32> to vector<1x16x128xf32>
    %176 = arith.mulf %173, %175 : vector<1x16x128xf32>
    %177 = arith.addf %172, %176 : vector<1x16x128xf32>
    %178 = vector.extract_strided_slice %167 {offsets = [0, 2, 0], sizes = [1, 16, 128], strides = [1, 1, 1]} : vector<1x18x128xf32> to vector<1x16x128xf32>
    %179 = vector.shape_cast %27 : vector<128xf32> to vector<1x1x128xf32>
    %180 = vector.broadcast %179 : vector<1x1x128xf32> to vector<1x16x128xf32>
    %181 = arith.mulf %178, %180 : vector<1x16x128xf32>
    %182 = arith.addf %177, %181 : vector<1x16x128xf32>
    %183 = vector.extract_strided_slice %168 {offsets = [0, 0, 0], sizes = [1, 16, 128], strides = [1, 1, 1]} : vector<1x18x128xf32> to vector<1x16x128xf32>
    %184 = vector.shape_cast %29 : vector<128xf32> to vector<1x1x128xf32>
    %185 = vector.broadcast %184 : vector<1x1x128xf32> to vector<1x16x128xf32>
    %186 = arith.mulf %183, %185 : vector<1x16x128xf32>
    %187 = arith.addf %182, %186 : vector<1x16x128xf32>
    %188 = vector.extract_strided_slice %168 {offsets = [0, 1, 0], sizes = [1, 16, 128], strides = [1, 1, 1]} : vector<1x18x128xf32> to vector<1x16x128xf32>
    %189 = vector.shape_cast %31 : vector<128xf32> to vector<1x1x128xf32>
    %190 = vector.broadcast %189 : vector<1x1x128xf32> to vector<1x16x128xf32>
    %191 = arith.mulf %188, %190 : vector<1x16x128xf32>
    %192 = arith.addf %187, %191 : vector<1x16x128xf32>
    %193 = vector.extract_strided_slice %168 {offsets = [0, 2, 0], sizes = [1, 16, 128], strides = [1, 1, 1]} : vector<1x18x128xf32> to vector<1x16x128xf32>
    %194 = vector.shape_cast %33 : vector<128xf32> to vector<1x1x128xf32>
    %195 = vector.broadcast %194 : vector<1x1x128xf32> to vector<1x16x128xf32>
    %196 = arith.mulf %193, %195 : vector<1x16x128xf32>
    %197 = arith.addf %192, %196 : vector<1x16x128xf32>
    %198 = vector.extract_strided_slice %15 {offsets = [0, 0, 0], sizes = [1, 16, 128], strides = [1, 1, 1]} : vector<1x18x128xf32> to vector<1x16x128xf32>
    %199 = vector.shape_cast %35 : vector<128xf32> to vector<1x1x128xf32>
    %200 = vector.broadcast %199 : vector<1x1x128xf32> to vector<1x16x128xf32>
    %201 = arith.mulf %198, %200 : vector<1x16x128xf32>
    %202 = arith.addf %197, %201 : vector<1x16x128xf32>
    %203 = vector.extract_strided_slice %15 {offsets = [0, 1, 0], sizes = [1, 16, 128], strides = [1, 1, 1]} : vector<1x18x128xf32> to vector<1x16x128xf32>
    %204 = vector.shape_cast %37 : vector<128xf32> to vector<1x1x128xf32>
    %205 = vector.broadcast %204 : vector<1x1x128xf32> to vector<1x16x128xf32>
    %206 = arith.mulf %203, %205 : vector<1x16x128xf32>
    %207 = arith.addf %202, %206 : vector<1x16x128xf32>
    %208 = vector.extract_strided_slice %15 {offsets = [0, 2, 0], sizes = [1, 16, 128], strides = [1, 1, 1]} : vector<1x18x128xf32> to vector<1x16x128xf32>
    %209 = vector.shape_cast %39 : vector<128xf32> to vector<1x1x128xf32>
    %210 = vector.broadcast %209 : vector<1x1x128xf32> to vector<1x16x128xf32>
    %211 = arith.mulf %208, %210 : vector<1x16x128xf32>
    %212 = arith.addf %207, %211 : vector<1x16x128xf32>
    %213 = vector.shape_cast %18 : vector<128xf32> to vector<1x1x128xf32>
    %214 = vector.broadcast %213 : vector<1x1x128xf32> to vector<1x16x128xf32>
    %215 = arith.addf %212, %214 : vector<1x16x128xf32>
    %cst_32 = arith.constant 0.000000e+00 : f32
    %216 = vector.broadcast %cst_32 : f32 to vector<1x16x128xf32>
    %217 = arith.maximumf %215, %216 : vector<1x16x128xf32>
    %218 = vector.shape_cast %217 : vector<1x16x128xf32> to vector<16x128xf32>
    %219 = arith.truncf %218 : vector<16x128xf32> to vector<16x128xbf16>
    %cst_33 = arith.constant dense<0.000000e+00> : vector<16x128xf32>
    %220 = tpu.matmul %219, %19, %cst_33 {dimension_numbers = #tpu.dot_dimension_numbers<[1], [0], [0], [1], [0, 0, 1, 1], [], []>} : vector<16x128xbf16>, vector<128x128xbf16>, vector<16x128xf32> -> vector<16x128xf32>
    %221 = vector.shape_cast %21 : vector<128xf32> to vector<1x128xf32>
    %222 = vector.broadcast %221 : vector<1x128xf32> to vector<16x128xf32>
    %223 = arith.addf %220, %222 : vector<16x128xf32>
    %cst_34 = arith.constant 0.000000e+00 : f32
    %224 = vector.broadcast %cst_34 : f32 to vector<16x128xf32>
    %225 = arith.maximumf %223, %224 : vector<16x128xf32>
    %226 = vector.shape_cast %225 : vector<16x128xf32> to vector<1x16x128xf32>
    %c0_35 = arith.constant 0 : index
    %c7 = arith.constant 7 : index
    %c0_36 = arith.constant 0 : index
    %c0_37 = arith.constant 0 : index
    %227 = vector.load %arg10[%c0_35, %c7, %c0_36, %c0_37] : memref<1x8x16x128xf32, #tpu.memory_space<vmem>>, vector<1x1x16x128xf32>
    %228 = vector.shape_cast %227 : vector<1x1x16x128xf32> to vector<1x16x128xf32>
    %229 = vector.shape_cast %226 : vector<1x16x128xf32> to vector<1x1x16x128xf32>
    tpu.vector_store %arg10[%c0_35, %c7, %c0_36, %c0_37], %229 {strides = array<i32>} : memref<1x8x16x128xf32, #tpu.memory_space<vmem>>, vector<1x1x16x128xf32>,
    return
  }
  func.func @transform_0(%arg0: i32, %arg1: i32, %arg2: i32) -> (i32, i32, i32, i32) {
    %c0_i32 = arith.constant 0 : i32
    %c0_i32_0 = arith.constant 0 : i32
    %c0_i32_1 = arith.constant 0 : i32
    return %arg0, %arg1, %c0_i32, %c0_i32_0 : i32, i32, i32, i32
  }
  func.func @transform_1(%arg0: i32, %arg1: i32, %arg2: i32) -> (i32, i32, i32, i32) {
    %c8_i32 = arith.constant 8 : i32
    %0 = arith.muli %arg1, %c8_i32 : i32
    %c1_i32 = arith.constant 1 : i32
    %1 = arith.subi %0, %c1_i32 : i32
    %c0_i32 = arith.constant 0 : i32
    %2 = arith.maxsi %1, %c0_i32 : i32
    %c0_i32_0 = arith.constant 0 : i32
    %c0_i32_1 = arith.constant 0 : i32
    %c0_i32_2 = arith.constant 0 : i32
    return %arg0, %2, %c0_i32_0, %c0_i32_1 : i32, i32, i32, i32
  }
  func.func @transform_2(%arg0: i32, %arg1: i32, %arg2: i32) -> (i32, i32, i32, i32) {
    %c1_i32 = arith.constant 1 : i32
    %0 = arith.addi %arg1, %c1_i32 : i32
    %c8_i32 = arith.constant 8 : i32
    %1 = arith.muli %0, %c8_i32 : i32
    %c15_i32 = arith.constant 15 : i32
    %2 = arith.minsi %1, %c15_i32 : i32
    %c0_i32 = arith.constant 0 : i32
    %c0_i32_0 = arith.constant 0 : i32
    %c0_i32_1 = arith.constant 0 : i32
    return %arg0, %2, %c0_i32, %c0_i32_0 : i32, i32, i32, i32
  }
  func.func @transform_3(%arg0: i32, %arg1: i32, %arg2: i32) -> (i32, i32, i32) {
    %c0_i32 = arith.constant 0 : i32
    %c0_i32_0 = arith.constant 0 : i32
    %c0_i32_1 = arith.constant 0 : i32
    %c0_i32_2 = arith.constant 0 : i32
    return %c0_i32, %c0_i32_0, %c0_i32_1 : i32, i32, i32
  }
  func.func @transform_4(%arg0: i32, %arg1: i32, %arg2: i32) -> (i32, i32) {
    %c0_i32 = arith.constant 0 : i32
    %c0_i32_0 = arith.constant 0 : i32
    %c0_i32_1 = arith.constant 0 : i32
    return %c0_i32, %c0_i32_0 : i32, i32
  }
  func.func @transform_5(%arg0: i32, %arg1: i32, %arg2: i32) -> (i32, i32) {
    %c0_i32 = arith.constant 0 : i32
    %c0_i32_0 = arith.constant 0 : i32
    return %c0_i32, %arg2 : i32, i32
  }
  func.func @transform_6(%arg0: i32, %arg1: i32, %arg2: i32) -> (i32, i32) {
    %c0_i32 = arith.constant 0 : i32
    %c0_i32_0 = arith.constant 0 : i32
    return %c0_i32, %arg2 : i32, i32
  }
  func.func @transform_7(%arg0: i32, %arg1: i32, %arg2: i32) -> (i32, i32, i32, i32) {
    %c0_i32 = arith.constant 0 : i32
    %c0_i32_0 = arith.constant 0 : i32
    return %arg0, %arg1, %c0_i32, %arg2 : i32, i32, i32, i32
  }
}

</mosaic_0001>

<bundles_post_ra>
// kernel: tpu_custom_call.1
= control target key start
LH: loop header
LB: loop body
LE: loop exit
PB: predicated region body
PF: predicated region fallthrough
CT: control target
= control target key end

     0   :  { %12 = vsyncpa [#allocation3], 0  ;;  %s2965_s0 = inlined_call_operand.vmem [shape: f32[2,16,18,128], index: 0, kind: input, shape index: {}]   ;;  %s2966_s1 = inlined_call_operand.vmem [shape: f32[2,16,18,128], index: 1, kind: input, shape index: {}]   ;;  %s2967_s2 = inlined_call_operand.vmem [shape: f32[2,16,18,128], index: 2, kind: input, shape index: {}]   ;;  %s2968_s3 = inlined_call_operand.vmem [shape: f32[3,3,128], index: 3, kind: input, shape index: {}]   ;;  %s2969_s4 = inlined_call_operand.vmem [shape: f32[1,128], index: 4, kind: input, shape index: {}]   ;;  %s2970_s5 = inlined_call_operand.vmem [shape: bf16[128,128], index: 5, kind: input, shape index: {}]   ;;  %s2971_s6 = inlined_call_operand.vmem [shape: f32[1,128], index: 6, kind: input, shape index: {}]   ;;  %s2972_s7 = inlined_call_operand.hbm [shape: f32[2,16,16,128], index: 7, kind: output, shape index: {}]  }
   0x1   :  { %14 = vsyncpa [#allocation3 + $0x1], 0  ;;  %s2063_s24 = smov 0   ;;  %s2065_s25 = smov 0  }
   0x2   :  { %s2067_s26 = smov 0   ;;  %s2069_s27 = smov 0  }
   0x3   :  { %s2071_s28 = smov 0   ;;  %s2073_s29 = smov 0  }
   0x4   :  { %s2075_s30 = smov 0   ;;  %s2077_s8 = smov 0  }
   0x5 LB: > { %s1724_s9 = sadd.s32 4294967295, %s2019_s8   ;;  %s1725_s10 = sadd.s32 4294967294, %s2019_s8   ;;  %s2019_s8 = sphi %s2077_s8, %s20_s8   ;;  %s2015_s30 = sphi %s2075_s30, %s2989_s30   ;;  %s2011_s29 = sphi %s2073_s29, %s2988_s29   ;;  %s2007_s28 = sphi %s2071_s28, %s2987_s28   ;;  %s2003_s27 = sphi %s2069_s27, %s2986_s27   ;;  %s1999_s26 = sphi %s2067_s26, %s2985_s26   ;;  %s1995_s25 = sphi %s2065_s25, %s2984_s25   ;;  %s1991_s24 = sphi %s2063_s24, %s2983_s24  }
   0x6   : > { %s35_s11 = sadd.s32 1, %s2011_s29  ;;  %s39_s12 = sadd.s32 1, %s2015_s30 }
   0x7   : > { %p37_p0 = scmp.ge.s32.totalorder %s35_s11, 2  ;;  %p254_p1 = scmp.ne.s32.totalorder %s1999_s26, %s1995_s25 }
   0x8   : > { %p255_p2 = scmp.eq.s32.totalorder %s1724_s9, 3  ;;  %p260_p5 = scmp.ne.s32.totalorder %s1995_s25, %s1991_s24 }
   0x9   : > { %s2991_s11 = smov (%p37_p0, %s35_s11), 0  ;;  %s2993_s12 = smov (!%p37_p0, %s39_s12), %s2015_s30 }
   0xa   : > { %2975 = sst [smem:[#allocation5_spill]] %s2991_s11  ;;  %s238_s13 = ssub.s32 %s2011_s29, %s2991_s11 }
   0xb   : > { %p2114_p3 = por %p255_p2, %p254_p1  ;;  %p41_p4 = scmp.ge.s32.totalorder %s2993_s12, 2 }
   0xc   : > { %p261_p6 = scmp.eq.s32.totalorder %s1725_s10, 3  ;;  %p1736_p7 = scmp.ge.s32.totalorder %s2019_s8, 1 }
   0xd   : > { %s2995_s12 = smov (%p41_p4, %s2993_s12), 0  ;;  %p352_p9 = scmp.lt.s32.totalorder %s2019_s8, 5 }
   0xe   : > { %2977 = sst [smem:[#allocation6_spill]] %s2995_s12  ;;  %p2123_p8 = por %p261_p6, %p260_p5 }
   0xf   : > { %s237_s16 = ssub.s32 %s2015_s30, %s2995_s12  ;;  %s244_s17 = sadd.s32 1, %s1999_s26 }
  0x10   : > { %s239_s18 = sor.u32 %s238_s13, %s237_s16  ;;  %p353_p10 = pnand %p1736_p7, %p352_p9 }
  0x11   : > { %p242_p11 = scmp.eq.s32.totalorder %s239_s18, 0  ;;  %s2140_s22 = sshll.u32 (!%p353_p10), %s2003_s27, 3 }
  0x12   : > { %356 = sbr.rel (%p353_p10) target bundleno = 335 (0x14f), region = 48  ;;  %p423_p12 = scmp.lt.s32.totalorder (!%p353_p10), %s2007_s28, 1 }
  0x13   : > { %s2132_s19 = scalar_select %p242_p11, %s1999_s26, %s244_s17  }
  0x14   : > { %p425_p13 = scmp.lt.s32.totalorder (!%p353_p10), %s2140_s22, 15  ;;  %s2979_s18 = sadd.s32 (!%p353_p10), 8, %s2140_s22 }
  0x15   : > { %p2176_p0 = scmp.lt.s32.totalorder (!%p353_p10), %s2979_s18, 15  ;;  %s2190_s11 = sadd.s32 (!%p353_p10), 4294967295, %s2140_s22 }
  0x16   : > { %p435_p1 = scmp.gt.s32.totalorder (!%p353_p10), %s2190_s11, 0  ;;  %p1742_p2 = scmp.lt.s32.totalorder (!%p353_p10), %s2190_s11, 15 }
  0x17   : > { %v2137_v0 = vld [vmem:[%s2970_s5 + $0x38] sm:$0xff]  ;;  %v2150_v1 = vld [vmem:[%s2970_s5 + $0x30] sm:$0xff]  ;;  %s424_s13 = scalar_select %p423_p12, %s2007_s28, 1  ;;  %v519_v2 = vld [vmem:[%s2968_s3] sm:$0x7]  ;;  %vm590_vm0 = vcmask 1046528  }
  0x18   : > { %1823 = vmatpush.bf16.msra.mxu1 %v2137_v0  ;;  %1824 = vmatpush.bf16.msra.mxu3 %v2137_v0  ;;  %s426_s16 = scalar_select %p425_p13, %s2140_s22, 15  ;;  %v2166_v3 = vld [vmem:[%s2970_s5 + $0x28] sm:$0xff]  ;;  %v520_v4 = vld [vmem:[%s2968_s3 + $0x4] sm:$0x7]  ;;  %v2183_v6 = vperm.slane %v519_v2, 0  ;;  %v2185_v7 = vperm.slane %v519_v2, 1 }
  0x19   : > { %1235 = vmatpush.bf16.msra.mxu0 %v2137_v0  ;;  %1527 = vmatpush.bf16.msra.mxu2 %v2137_v0  ;;  %s2156_s17 = smul.u32 48, %s424_s13  ;;  %v521_v5 = vld [vmem:[%s2968_s3 + $0x8] sm:$0x7]  ;;  %v2187_v8 = vperm.slane %v519_v2, 2  ;;  %vm682_vm1 = vcmask 1045504   ;;  %v2195_v9 = vld [vmem:[%s2970_s5 + $0x20] sm:$0xff] }
  0x1a   : > { %s1839_s21 = smul.u32 3, %s426_s16  ;;  %v2202_v10 = vperm.slane %v520_v4, 0  ;;  %v2204_v11 = vperm.slane %v520_v4, 1  ;;  %v2206_v12 = vperm.slane %v520_v4, 2  ;;  %v2208_v13 = vperm.slane %v521_v5, 0  ;;  %s2997_s18 = smov (!%p2176_p0, %s2979_s18), 15 }
  0x1b   : > { %v2221_v17 = vperm.slane %v521_v5, 1  ;;  %v2243_v23 = vperm.slane %v521_v5, 2  ;;  %s2999_s18 = smov (!%p2176_p0, %s2997_s18), 15  ;;  %v2271_v33 = vld [vmem:[%s2970_s5 + $0x18] sm:$0xff]  ;;  %v2300_v50 = vld [vmem:[%s2970_s5 + $0x10] sm:$0xff]  ;;  %p478_p4 = scmp.lt.s32.totalorder %s2003_s27, 1 }
  0x1c   : > { %1825 = vmatpush.bf16.msra.mxu1 %v2150_v1  ;;  %1826 = vmatpush.bf16.msra.mxu3 %v2150_v1  ;;  %s429_s20 = sadd.s32 %s2156_s17, %s1839_s21  ;;  %s2281_s16 = smul.u32 3, %s2999_s18 }
  0x1d   : > { %1236 = vmatpush.bf16.msra.mxu0 %v2150_v1  ;;  %1528 = vmatpush.bf16.msra.mxu2 %v2150_v1  ;;  %s1739_s12 = sshll.u32 %s429_s20, 3  ;;  %p475_p5 = scmp.gt.s32.totalorder %s2003_s27, 0 }
  0x1e   : > { %s2200_s13 = scalar_lea.vmem %s2965_s0, %s1739_s12  ;;  %s460_s23 = sadd.s32 %s2281_s16, %s2156_s17 }
  0x1f   : > { %v2213_v14 = vld [vmem:[%s2200_s13 + $0x30] sm:$0xff]  ;;  %v2216_v15 = vld [vmem:[%s2200_s13 + $0x38] sm:$0xff]  ;;  %v2219_v16 = vld [vmem:[%s2200_s13 + $0x40] sm:$0x3]  ;;  %s436_s12 = scalar_select %p435_p1, %s2190_s11, 0 }
  0x20   : > { %1827 = vmatpush.bf16.msra.mxu1 %v2166_v3  ;;  %1828 = vmatpush.bf16.msra.mxu3 %v2166_v3  ;;  %v2232_v18 = vld [vmem:[%s2200_s13 + $0x48] sm:$0xff]  ;;  %v2235_v19 = vld [vmem:[%s2200_s13 + $0x50] sm:$0xff]  ;;  %v545_v20 = vmul.f32 %v2183_v6, %v2213_v14  ;;  %v546_v21 = vmul.f32 %v2183_v6, %v2216_v15  ;;  %v560_v22 = vmul.f32 %v2185_v7, %v2213_v14  ;;  %v2247_v24 = vld [vmem:[%s2200_s13 + $0x58] sm:$0x3]  ;;  %s2638_s21 = scalar_select %p478_p4, 1, 0 }
  0x21   : > { %1237 = vmatpush.bf16.msra.mxu0 %v2166_v3  ;;  %1529 = vmatpush.bf16.msra.mxu2 %v2166_v3  ;;  %v561_v25 = vmul.f32 %v2185_v7, %v2216_v15  ;;  %v562_v26 = vmul.f32 %v2185_v7, %v2219_v16  ;;  %v652_v27 = vmul.f32 %v2187_v8, %v2213_v14  ;;  %v2303_v51 = vld [vmem:[%s2200_s13 + $0x60] sm:$0xff]  ;;  %v2314_v60 = vld [vmem:[%s2200_s13 + $0x68] sm:$0xff]  ;;  %s3001_s12 = smov (!%p1742_p2, %s436_s12), 15  ;;  %s1752_s18 = sshll.u32 %s460_s23, 3 }
  0x22   : > { %v653_v28 = vmul.f32 %v2187_v8, %v2216_v15  ;;  %v601_v29 = vrot.slane %v560_v22, 1  ;;  %v654_v30 = vmul.f32 %v2187_v8, %v2219_v16  ;;  %v742_v31 = vmul.f32 %v2202_v10, %v2232_v18  ;;  %v2329_v22 = vld [vmem:[%s2970_s5 + $0x8] sm:$0xff]  ;;  %s1841_s11 = smul.u32 3, %s3001_s12  ;;  %s462_s23 = scalar_lea.vmem %s2967_s2, %s1752_s18 }
  0x23   : > { %v743_v32 = vmul.f32 %v2202_v10, %v2235_v19  ;;  %v602_v34 = vrot.slane %v561_v25, 1  ;;  %v604_v35 = vrot.slane %v562_v26, 1  ;;  %v693_v36 = vrot.slane %v652_v27, 2  ;;  %v2332_v25 = vld [vmem:[%s2200_s13 + $0x70] sm:$0x3] }
  0x24   : > { %1829 = vmatpush.bf16.msra.mxu1 %v2195_v9  ;;  %1830 = vmatpush.bf16.msra.mxu3 %v2195_v9  ;;  %v694_v37 = vrot.slane %v653_v28, 2  ;;  %v696_v38 = vrot.slane %v654_v30, 2  ;;  %v769_v39 = vmul.f32 %v2204_v11, %v2232_v18  ;;  %v770_v40 = vmul.f32 %v2204_v11, %v2235_v19  ;;  %s2349_s22 = sadd.s32 %s1841_s11, %s2156_s17  ;;  %s480_s11 = scvt.s32.f32 %s2638_s21 }
  0x25   : > { %1238 = vmatpush.bf16.msra.mxu0 %v2195_v9  ;;  %1530 = vmatpush.bf16.msra.mxu2 %v2195_v9  ;;  %v771_v41 = vmul.f32 %v2204_v11, %v2247_v24  ;;  %v603_v42 = vsel %vm590_vm0, %v601_v29, %v602_v34  ;;  %v605_v43 = vsel %vm590_vm0, %v602_v34, %v604_v35  ;;  %s2788_s20 = scalar_select %p475_p5, 1, 0 }
  0x26   : > { %v695_v44 = vsel %vm682_vm1, %v693_v36, %v694_v37  ;;  %v860_v45 = vmul.f32 %v2206_v12, %v2232_v18  ;;  %v637_v46 = vadd.f32 %v603_v42, %v545_v20  ;;  %v638_v47 = vadd.f32 %v605_v43, %v546_v21  ;;  %v2358_v42 = vld [vmem:[%s2970_s5] sm:$0xff]  ;;  %s1747_s12 = sshll.u32 %s2349_s22, 3  ;;  %s419_s17 = sand.u32 1, %s1995_s25  }
  0x27   : > { %v697_v48 = vsel %vm682_vm1, %v694_v37, %v696_v38  ;;  %v809_v49 = vrot.slane %v769_v39, 1  ;;  %v810_v52 = vrot.slane %v770_v40, 1  ;;  %v812_v53 = vrot.slane %v771_v41, 1  ;;  %s445_s10 = scalar_lea.vmem %s2966_s1, %s1747_s12  ;;  %s477_s21 = scvt.s32.f32 %s2788_s20 }
  0x28   : > { %1831 = vmatpush.bf16.msra.mxu1 %v2271_v33  ;;  %1832 = vmatpush.bf16.msra.mxu3 %v2271_v33  ;;  %v861_v54 = vmul.f32 %v2206_v12, %v2235_v19  ;;  %v862_v55 = vmul.f32 %v2206_v12, %v2247_v24  ;;  %v729_v56 = vadd.f32 %v695_v44, %v637_v46  ;;  %v900_v58 = vrot.slane %v860_v45, 2  ;;  %s1822_s12 = sshll.u32 %s2003_s27, 4  ;;  %s1802_s22 = sshll.u32 %s2007_s28, 5 }
  0x29   : > { %1239 = vmatpush.bf16.msra.mxu0 %v2271_v33  ;;  %v730_v57 = vadd.f32 %v697_v48, %v638_v47  ;;  %v949_v59 = vmul.f32 %v2208_v13, %v2303_v51  ;;  %1531 = vmatpush.bf16.msra.mxu2 %v2271_v33  ;;  %v811_v61 = vsel %vm590_vm0, %v809_v49, %v810_v52  ;;  %s1560_s9 = sadd.s32 %s1822_s12, %s1802_s22  ;;  %s1547_s27 = scalar_lea.sflag [#allocation3], %s419_s17 }
  0x2a   : > { %v813_v62 = vsel %vm590_vm0, %v810_v52, %v812_v53  ;;  %v901_v63 = vrot.slane %v861_v54, 2  ;;  %v903_v2 = vrot.slane %v862_v55, 2  ;;  %v754_v4 = vadd.f32 %v742_v31, %v729_v56 }
  0x2b   : > { %v755_v5 = vadd.f32 %v743_v32, %v730_v57  ;;  %v950_v20 = vmul.f32 %v2208_v13, %v2314_v60  ;;  %v976_v21 = vmul.f32 %v2221_v17, %v2303_v51  ;;  %v977_v28 = vmul.f32 %v2221_v17, %v2314_v60 }
  0x2c   : > { %1833 = vmatpush.bf16.msra.mxu1 %v2300_v50  ;;  %1834 = vmatpush.bf16.msra.mxu3 %v2300_v50  ;;  %v902_v26 = vsel %vm682_vm1, %v900_v58, %v901_v63  ;;  %v904_v27 = vsel %vm682_vm1, %v901_v63, %v903_v2  ;;  %v845_v29 = vadd.f32 %v811_v61, %v754_v4  ;;  %v2378_v61 = vld [vmem:[%s2200_s13 + $0x78] sm:$0xff] }
  0x2d   : > { %1240 = vmatpush.bf16.msra.mxu0 %v2300_v50  ;;  %v846_v30 = vadd.f32 %v813_v62, %v755_v5  ;;  %v978_v31 = vmul.f32 %v2221_v17, %v2332_v25  ;;  %v1016_v32 = vrot.slane %v976_v21, 1  ;;  %1532 = vmatpush.bf16.msra.mxu2 %v2300_v50  ;;  %v1017_v34 = vrot.slane %v977_v28, 1 }
  0x2e   : > { %v1067_v35 = vmul.f32 %v2243_v23, %v2303_v51  ;;  %v1068_v36 = vmul.f32 %v2243_v23, %v2314_v60  ;;  %v1069_v37 = vmul.f32 %v2243_v23, %v2332_v25  ;;  %v936_v38 = vadd.f32 %v902_v26, %v845_v29 }
  0x2f   : > { %v937_v39 = vadd.f32 %v904_v27, %v846_v30  ;;  %v1019_v40 = vrot.slane %v978_v31, 1  ;;  %v549_v41 = vmul.f32 %v2183_v6, %v2303_v51  ;;  %v1018_v43 = vsel %vm590_vm0, %v1016_v32, %v1017_v34  ;;  %v2392_v27 = vld [vmem:[%s2200_s13 + $0x80] sm:$0xff] }
  0x30   : > { %1835 = vmatpush.bf16.msra.mxu1 %v2329_v22  ;;  %1836 = vmatpush.bf16.msra.mxu3 %v2329_v22  ;;  %v1107_v44 = vrot.slane %v1067_v35, 2  ;;  %v1108_v45 = vrot.slane %v1068_v36, 2  ;;  %v1110_v46 = vrot.slane %v1069_v37, 2  ;;  %v961_v47 = vadd.f32 %v949_v59, %v936_v38  ;;  %v2375_v59 = vld [vmem:[%s2969_s4] ss:$0 sm:$0xff] }
  0x31   : > { %v962_v48 = vadd.f32 %v950_v20, %v937_v39  ;;  %v1020_v49 = vsel %vm590_vm0, %v1017_v34, %v1019_v40  ;;  %1241 = vmatpush.bf16.msra.mxu0 %v2329_v22  ;;  %v550_v52 = vmul.f32 %v2183_v6, %v2314_v60  ;;  %v566_v55 = vmul.f32 %v2185_v7, %v2303_v51  ;;  %v2402_v36 = vld [vmem:[%s2200_s13 + $0x88] sm:$0x3] }
  0x32   : > { %v1109_v53 = vsel %vm682_vm1, %v1107_v44, %v1108_v45  ;;  %v1111_v54 = vsel %vm682_vm1, %v1108_v45, %v1110_v46  ;;  %v567_v56 = vmul.f32 %v2185_v7, %v2314_v60  ;;  %1533 = vmatpush.bf16.msra.mxu2 %v2329_v22  ;;  %v1052_v57 = vadd.f32 %v1018_v43, %v961_v47 }
  0x33   : > { %v1053_v58 = vadd.f32 %v1020_v49, %v962_v48  ;;  %v568_v62 = vmul.f32 %v2185_v7, %v2332_v25  ;;  %v658_v63 = vmul.f32 %v2187_v8, %v2303_v51  ;;  %v611_v2 = vrot.slane %v566_v55, 1  ;;  %v2413_v49 = vld [vmem:[%s2200_s13 + $0x90] sm:$0xff] }
  0x34   : > { %1837 = vmatpush.bf16.msra.mxu1 %v2358_v42  ;;  %1838 = vmatpush.bf16.msra.mxu3 %v2358_v42  ;;  %v612_v4 = vrot.slane %v567_v56, 1  ;;  %v659_v5 = vmul.f32 %v2187_v8, %v2314_v60  ;;  %v660_v20 = vmul.f32 %v2187_v8, %v2332_v25  ;;  %v1143_v21 = vadd.f32 %v1109_v53, %v1052_v57 }
  0x35   : > { %v1144_v26 = vadd.f32 %v1111_v54, %v1053_v58  ;;  %v614_v28 = vrot.slane %v568_v62, 1  ;;  %v703_v29 = vrot.slane %v658_v63, 2  ;;  %1242 = vmatpush.bf16.msra.mxu0 %v2358_v42  ;;  %v746_v34 = vmul.f32 %v2202_v10, %v2378_v61 }
  0x36   : > { %v613_v30 = vsel %vm590_vm0, %v611_v2, %v612_v4  ;;  %v704_v31 = vrot.slane %v659_v5, 2  ;;  %v706_v32 = vrot.slane %v660_v20, 2  ;;  %1534 = vmatpush.bf16.msra.mxu2 %v2358_v42  ;;  %v1158_v35 = vadd.f32 %v2375_v59, %v1143_v21  ;;  %v2429_v5 = vld [vmem:[%s2200_s13 + $0xa0] sm:$0x3] }
  0x37   : > { %v615_v37 = vsel %vm590_vm0, %v612_v4, %v614_v28  ;;  %v641_v38 = vadd.f32 %v613_v30, %v549_v41  ;;  %v747_v44 = vmul.f32 %v2202_v10, %v2392_v27  ;;  %v775_v48 = vmul.f32 %v2204_v11, %v2378_v61  ;;  %v2416_v41 = vld [vmem:[%s2200_s13 + $0x98] sm:$0xff] }
  0x38   : > { %1404 = vmatpush.bf16.msrb.mxu1 %v2137_v0  ;;  %v1159_v0 = vadd.f32 %v2375_v59, %v1144_v26  ;;  %v642_v39 = vadd.f32 %v615_v37, %v550_v52  ;;  %v705_v40 = vsel %vm682_vm1, %v703_v29, %v704_v31  ;;  %v707_v43 = vsel %vm682_vm1, %v704_v31, %v706_v32 }
  0x39   : > { %v1170_v45 = vmax.f32 %v1158_v35, 0.0  ;;  %v733_v47 = vadd.f32 %v705_v40, %v641_v38  ;;  %v776_v53 = vmul.f32 %v2204_v11, %v2392_v27  ;;  %v777_v54 = vmul.f32 %v2204_v11, %v2402_v36 }
  0x3a   : > { %v1171_v46 = vmax.f32 %v1159_v0, 0.0  ;;  %v734_v52 = vadd.f32 %v707_v43, %v642_v39  ;;  %v866_v55 = vmul.f32 %v2206_v12, %v2378_v61  ;;  %v819_v58 = vrot.slane %v775_v48, 1 }
  0x3b   : > { %v758_v57 = vadd.f32 %v746_v34, %v733_v47  ;;  %v820_v63 = vrot.slane %v776_v53, 1  ;;  %v822_v2 = vrot.slane %v777_v54, 1  ;;  %v868_v4 = vmul.f32 %v2206_v12, %v2402_v36  ;;  %v2451_v47 = vld [vmem:[%s2200_s13] sm:$0xff]  ;;  %v2456_v54 = vld [vmem:[%s2200_s13 + $0x8] sm:$0xff] }
  0x3c   : > { %1405 = vmatpush.bf16.msrb.mxu1 %v2150_v1  ;;  %v1180_v56 = vpack.c.bf16 %v1171_v46, %v1170_v45  ;;  %v867_v1 = vmul.f32 %v2206_v12, %v2392_v27  ;;  %v759_v62 = vadd.f32 %v747_v44, %v734_v52  ;;  %v910_v20 = vrot.slane %v866_v55, 2 }
  0x3d   : > { %v953_v26 = vmul.f32 %v2208_v13, %v2413_v49  ;;  %v954_v28 = vmul.f32 %v2208_v13, %v2416_v41  ;;  %v821_v29 = vsel %vm590_vm0, %v819_v58, %v820_v63  ;;  %v823_v30 = vsel %vm590_vm0, %v820_v63, %v822_v2 }
  0x3e   : > { %1253 = vmatmul.bf16.vlgmr.msra.gmra.mxu1 %v1180_v56  ;;  %v911_v21 = vrot.slane %v867_v1, 2  ;;  %v913_v31 = vrot.slane %v868_v4, 2  ;;  %v982_v32 = vmul.f32 %v2221_v17, %v2413_v49  ;;  %v849_v34 = vadd.f32 %v821_v29, %v758_v57 }
  0x3f   : > { %v850_v35 = vadd.f32 %v823_v30, %v759_v62  ;;  %v983_v37 = vmul.f32 %v2221_v17, %v2416_v41  ;;  %v984_v39 = vmul.f32 %v2221_v17, %v2429_v5  ;;  %v1073_v43 = vmul.f32 %v2243_v23, %v2413_v49  ;;  %v2463_v62 = vld [vmem:[%s2200_s13 + $0x10] sm:$0x3] }
  0x40   : > { %1406 = vmatpush.bf16.msrb.mxu1 %v2166_v3  ;;  %v912_v0 = vsel %vm682_vm1, %v910_v20, %v911_v21  ;;  %v914_v38 = vsel %vm682_vm1, %v911_v21, %v913_v31  ;;  %v1026_v40 = vrot.slane %v982_v32, 1  ;;  %v1074_v46 = vmul.f32 %v2243_v23, %v2416_v41 }
  0x41   : > { %v940_v44 = vadd.f32 %v912_v0, %v849_v34  ;;  %v941_v3 = vadd.f32 %v914_v38, %v850_v35  ;;  %v1027_v45 = vrot.slane %v983_v37, 1  ;;  %v1029_v48 = vrot.slane %v984_v39, 1  ;;  %v2483_v37 = vld [vmem:[%s2200_s13 + $0x20] sm:$0xff] }
  0x42   : > { %v1075_v52 = vmul.f32 %v2243_v23, %v2429_v5  ;;  %v1117_v53 = vrot.slane %v1073_v43, 2  ;;  %v541_v55 = vmul.f32 %v2183_v6, %v2451_v47  ;;  %v1118_v1 = vrot.slane %v1074_v46, 2 }
  0x43   : > { %v965_v56 = vadd.f32 %v953_v26, %v940_v44  ;;  %v966_v57 = vadd.f32 %v954_v28, %v941_v3  ;;  %v1028_v58 = vsel %vm590_vm0, %v1026_v40, %v1027_v45  ;;  %v1030_v63 = vsel %vm590_vm0, %v1027_v45, %v1029_v48  ;;  %v2472_v26 = vld [vmem:[%s2200_s13 + $0x18] sm:$0xff] }
  0x44   : > { %1407 = vmatpush.bf16.msrb.mxu1 %v2195_v9  ;;  %v1120_v2 = vrot.slane %v1075_v52, 2  ;;  %v542_v4 = vmul.f32 %v2183_v6, %v2456_v54  ;;  %v554_v20 = vmul.f32 %v2185_v7, %v2451_v47  ;;  %v1119_v9 = vsel %vm682_vm1, %v1117_v53, %v1118_v1  ;;  %v2495_v52 = vld [vmem:[%s2200_s13 + $0x28] sm:$0x3] }
  0x45   : > { %v1056_v21 = vadd.f32 %v1028_v58, %v965_v56  ;;  %v1057_v29 = vadd.f32 %v1030_v63, %v966_v57  ;;  %v555_v28 = vmul.f32 %v2185_v7, %v2456_v54  ;;  %v556_v31 = vmul.f32 %v2185_v7, %v2463_v62 }
  0x46   : > { %v1121_v30 = vsel %vm682_vm1, %v1118_v1, %v1120_v2  ;;  %v591_v32 = vrot.slane %v554_v20, 1  ;;  %v646_v34 = vmul.f32 %v2187_v8, %v2451_v47  ;;  %v647_v39 = vmul.f32 %v2187_v8, %v2456_v54 }
  0x47   : > { %v1147_v35 = vadd.f32 %v1119_v9, %v1056_v21  ;;  %v1148_v0 = vadd.f32 %v1121_v30, %v1057_v29  ;;  %v592_v38 = vrot.slane %v555_v28, 1  ;;  %v594_v40 = vrot.slane %v556_v31, 1 }
  0x48   : > { %1408 = vmatpush.bf16.msrb.mxu1 %v2271_v33  ;;  %v648_v43 = vmul.f32 %v2187_v8, %v2463_v62  ;;  %v683_v44 = vrot.slane %v646_v34, 2  ;;  %v738_v3 = vmul.f32 %v2202_v10, %v2472_v26  ;;  %v684_v48 = vrot.slane %v647_v39, 2 }
  0x49   : > { %v1162_v45 = vadd.f32 %v2375_v59, %v1147_v35  ;;  %v1163_v33 = vadd.f32 %v2375_v59, %v1148_v0  ;;  %v593_v46 = vsel %vm590_vm0, %v591_v32, %v592_v38  ;;  %v595_v53 = vsel %vm590_vm0, %v592_v38, %v594_v40 }
  0x4a   : > { %v633_v56 = vadd.f32 %v593_v46, %v541_v55  ;;  %v686_v57 = vrot.slane %v648_v43, 2  ;;  %v739_v58 = vmul.f32 %v2202_v10, %v2483_v37  ;;  %v634_v2 = vadd.f32 %v595_v53, %v542_v4 }
  0x4b   : > { %v1174_v1 = vmax.f32 %v1162_v45, 0.0  ;;  %v1175_v63 = vmax.f32 %v1163_v33, 0.0  ;;  %v685_v20 = vsel %vm682_vm1, %v683_v44, %v684_v48  ;;  %v763_v9 = vmul.f32 %v2204_v11, %v2472_v26 }
  0x4c   : > { %1409 = vmatpush.bf16.msrb.mxu1 %v2300_v50  ;;  %v687_v21 = vsel %vm682_vm1, %v684_v48, %v686_v57  ;;  %v725_v29 = vadd.f32 %v685_v20, %v633_v56  ;;  %v764_v55 = vmul.f32 %v2204_v11, %v2483_v37  ;;  %v765_v31 = vmul.f32 %v2204_v11, %v2495_v52 }
  0x4d   : > { %v1182_v28 = vpack.c.bf16 %v1175_v63, %v1174_v1  ;;  %v726_v30 = vadd.f32 %v687_v21, %v634_v2  ;;  %v854_v50 = vmul.f32 %v2206_v12, %v2472_v26  ;;  %v799_v32 = vrot.slane %v763_v9, 1 }
  0x4e   : > { %v750_v4 = vadd.f32 %v738_v3, %v725_v29  ;;  %v800_v34 = vrot.slane %v764_v55, 1  ;;  %v855_v35 = vmul.f32 %v2206_v12, %v2483_v37  ;;  %v802_v38 = vrot.slane %v765_v31, 1 }
  0x4f   : > { %1263 = vmatmul.bf16.vlgmr.msra.gmra.mxu3 %v1182_v28  ;;  %v751_v0 = vadd.f32 %v739_v58, %v726_v30  ;;  %v856_v39 = vmul.f32 %v2206_v12, %v2495_v52  ;;  %v890_v40 = vrot.slane %v854_v50, 2  ;;  %v945_v3 = vmul.f32 %v2208_v13, %v2213_v14 }
  0x50   : > { %1410 = vmatpush.bf16.msrb.mxu1 %v2329_v22  ;;  %v801_v43 = vsel %vm590_vm0, %v799_v32, %v800_v34  ;;  %v891_v44 = vrot.slane %v855_v35, 2  ;;  %v946_v45 = vmul.f32 %v2208_v13, %v2216_v15  ;;  %v803_v33 = vsel %vm590_vm0, %v800_v34, %v802_v38 }
  0x51   : > { %v841_v46 = vadd.f32 %v801_v43, %v750_v4  ;;  %v893_v22 = vrot.slane %v856_v39, 2  ;;  %v970_v48 = vmul.f32 %v2221_v17, %v2213_v14  ;;  %v842_v53 = vadd.f32 %v803_v33, %v751_v0 }
  0x52   : > { %v892_v56 = vsel %vm682_vm1, %v890_v40, %v891_v44  ;;  %v971_v57 = vmul.f32 %v2221_v17, %v2216_v15  ;;  %v972_v58 = vmul.f32 %v2221_v17, %v2219_v16  ;;  %v1061_v20 = vmul.f32 %v2243_v23, %v2213_v14 }
  0x53   : > { %v894_v1 = vsel %vm682_vm1, %v891_v44, %v893_v22  ;;  %v932_v63 = vadd.f32 %v892_v56, %v841_v46  ;;  %v1006_v2 = vrot.slane %v970_v48, 1  ;;  %v1062_v55 = vmul.f32 %v2243_v23, %v2216_v15 }
  0x54   : > { %1411 = vmatpush.bf16.msrb.mxu1 %v2358_v42  ;;  %v933_v21 = vadd.f32 %v894_v1, %v842_v53  ;;  %v1007_v29 = vrot.slane %v971_v57, 1  ;;  %v1009_v9 = vrot.slane %v972_v58, 1  ;;  %v1063_v30 = vmul.f32 %v2243_v23, %v2219_v16 }
  0x55   : > { %v957_v28 = vadd.f32 %v945_v3, %v932_v63  ;;  %v1097_v31 = vrot.slane %v1061_v20, 2  ;;  %v547_v42 = vmul.f32 %v2183_v6, %v2232_v18  ;;  %v1098_v14 = vrot.slane %v1062_v55, 2 }
  0x56   : > { %v958_v50 = vadd.f32 %v946_v45, %v933_v21  ;;  %v1008_v4 = vsel %vm590_vm0, %v1006_v2, %v1007_v29  ;;  %v1010_v32 = vsel %vm590_vm0, %v1007_v29, %v1009_v9  ;;  %v1100_v35 = vrot.slane %v1063_v30, 2 }
  0x57   : > { %v1048_v34 = vadd.f32 %v1008_v4, %v957_v28  ;;  %v548_v0 = vmul.f32 %v2183_v6, %v2235_v19  ;;  %v563_v15 = vmul.f32 %v2185_v7, %v2232_v18  ;;  %v1099_v16 = vsel %vm682_vm1, %v1097_v31, %v1098_v14 }
  0x58   : > { %v1049_v38 = vadd.f32 %v1010_v32, %v958_v50  ;;  %v564_v39 = vmul.f32 %v2185_v7, %v2235_v19  ;;  %v565_v40 = vmul.f32 %v2185_v7, %v2247_v24  ;;  %v1101_v43 = vsel %vm682_vm1, %v1098_v14, %v1100_v35 }
  0x59   : > { %v1139_v44 = vadd.f32 %v1099_v16, %v1048_v34  ;;  %v606_v3 = vrot.slane %v563_v15, 1  ;;  %v655_v45 = vmul.f32 %v2187_v8, %v2232_v18  ;;  %v656_v48 = vmul.f32 %v2187_v8, %v2235_v19 }
  0x5a   : > { %v1140_v33 = vadd.f32 %v1101_v43, %v1049_v38  ;;  %v607_v46 = vrot.slane %v564_v39, 1  ;;  %v609_v22 = vrot.slane %v565_v40, 1  ;;  %v657_v56 = vmul.f32 %v2187_v8, %v2247_v24 }
  0x5b   : > { %v1154_v53 = vadd.f32 %v2375_v59, %v1139_v44  ;;  %v698_v57 = vrot.slane %v655_v45, 2  ;;  %v744_v58 = vmul.f32 %v2202_v10, %v2303_v51  ;;  %v699_v2 = vrot.slane %v656_v48, 2 }
  0x5c   : > { %v1155_v1 = vadd.f32 %v2375_v59, %v1140_v33  ;;  %v608_v63 = vsel %vm590_vm0, %v606_v3, %v607_v46  ;;  %v610_v18 = vsel %vm590_vm0, %v607_v46, %v609_v22  ;;  %v701_v19 = vrot.slane %v657_v56, 2 }
  0x5d   : > { %v1166_v20 = vmax.f32 %v1154_v53, 0.0  ;;  %v639_v21 = vadd.f32 %v608_v63, %v547_v42  ;;  %v640_v29 = vadd.f32 %v610_v18, %v548_v0  ;;  %v700_v55 = vsel %vm682_vm1, %v698_v57, %v699_v2 }
  0x5e   : > { %v1167_v9 = vmax.f32 %v1155_v1, 0.0  ;;  %v745_v24 = vmul.f32 %v2202_v10, %v2314_v60  ;;  %v772_v28 = vmul.f32 %v2204_v11, %v2303_v51  ;;  %v702_v30 = vsel %vm682_vm1, %v699_v2, %v701_v19 }
  0x5f   : > { %v731_v31 = vadd.f32 %v700_v55, %v639_v21  ;;  %v773_v50 = vmul.f32 %v2204_v11, %v2314_v60  ;;  %v774_v42 = vmul.f32 %v2204_v11, %v2332_v25  ;;  %v732_v32 = vadd.f32 %v702_v30, %v640_v29 }
  0x60   : > { %v1178_v4 = vpack.c.bf16 %v1167_v9, %v1166_v20  ;;  %v814_v14 = vrot.slane %v772_v28, 1  ;;  %v863_v34 = vmul.f32 %v2206_v12, %v2303_v51  ;;  %v864_v38 = vmul.f32 %v2206_v12, %v2314_v60 }
  0x61   : > { %v756_v35 = vadd.f32 %v744_v58, %v731_v31  ;;  %v815_v0 = vrot.slane %v773_v50, 1  ;;  %v817_v15 = vrot.slane %v774_v42, 1  ;;  %v757_v16 = vadd.f32 %v745_v24, %v732_v32 }
  0x62   : > { %1243 = vmatmul.bf16.vlgmr.msra.gmra.mxu0 %v1178_v4  ;;  %v865_v39 = vmul.f32 %v2206_v12, %v2332_v25  ;;  %v905_v40 = vrot.slane %v863_v34, 2  ;;  %v951_v43 = vmul.f32 %v2208_v13, %v2378_v61  ;;  %v906_v51 = vrot.slane %v864_v38, 2 }
  0x63   : > { %v816_v44 = vsel %vm590_vm0, %v814_v14, %v815_v0  ;;  %v818_v3 = vsel %vm590_vm0, %v815_v0, %v817_v15  ;;  %v952_v45 = vmul.f32 %v2208_v13, %v2392_v27  ;;  %v979_v22 = vmul.f32 %v2221_v17, %v2378_v61 }
  0x64   : > { %v847_v33 = vadd.f32 %v816_v44, %v756_v35  ;;  %v848_v46 = vadd.f32 %v818_v3, %v757_v16  ;;  %v908_v60 = vrot.slane %v865_v39, 2  ;;  %v907_v25 = vsel %vm682_vm1, %v905_v40, %v906_v51 }
  0x65   : > { %v980_v48 = vmul.f32 %v2221_v17, %v2392_v27  ;;  %v981_v53 = vmul.f32 %v2221_v17, %v2402_v36  ;;  %v1070_v56 = vmul.f32 %v2243_v23, %v2378_v61  ;;  %v1021_v1 = vrot.slane %v979_v22, 1 }
  0x66   : > { %v909_v57 = vsel %vm682_vm1, %v906_v51, %v908_v60  ;;  %v938_v58 = vadd.f32 %v907_v25, %v847_v33  ;;  %v1071_v63 = vmul.f32 %v2243_v23, %v2392_v27  ;;  %v1072_v21 = vmul.f32 %v2243_v23, %v2402_v36 }
  0x67   : > { %v939_v18 = vadd.f32 %v909_v57, %v848_v46  ;;  %v1022_v2 = vrot.slane %v980_v48, 1  ;;  %v1024_v20 = vrot.slane %v981_v53, 1  ;;  %v1112_v19 = vrot.slane %v1070_v56, 2 }
  0x68   : > { %v963_v29 = vadd.f32 %v951_v43, %v938_v58  ;;  %v1113_v9 = vrot.slane %v1071_v63, 2  ;;  %v551_v55 = vmul.f32 %v2183_v6, %v2378_v61  ;;  %v1115_v31 = vrot.slane %v1072_v21, 2 }
  0x69   : > { %v964_v24 = vadd.f32 %v952_v45, %v939_v18  ;;  %v1023_v28 = vsel %vm590_vm0, %v1021_v1, %v1022_v2  ;;  %v1025_v30 = vsel %vm590_vm0, %v1022_v2, %v1024_v20  ;;  %v552_v4 = vmul.f32 %v2183_v6, %v2392_v27 }
  0x6a   : > { %v1054_v50 = vadd.f32 %v1023_v28, %v963_v29  ;;  %v1114_v42 = vsel %vm682_vm1, %v1112_v19, %v1113_v9  ;;  %v569_v32 = vmul.f32 %v2185_v7, %v2378_v61  ;;  %v1116_v34 = vsel %vm682_vm1, %v1113_v9, %v1115_v31 }
  0x6b   : > { %v1055_v14 = vadd.f32 %v1025_v30, %v964_v24  ;;  %v570_v35 = vmul.f32 %v2185_v7, %v2392_v27  ;;  %v571_v0 = vmul.f32 %v2185_v7, %v2402_v36  ;;  %v661_v16 = vmul.f32 %v2187_v8, %v2378_v61 }
  0x6c   : > { %v1145_v15 = vadd.f32 %v1114_v42, %v1054_v50  ;;  %v616_v38 = vrot.slane %v569_v32, 1  ;;  %v662_v39 = vmul.f32 %v2187_v8, %v2392_v27  ;;  %v663_v3 = vmul.f32 %v2187_v8, %v2402_v36  ;;  %v2651_v50 = vld [vmem:[%s2200_s13 + $0xb0] sm:$0xff] }
  0x6d   : > { %v1146_v40 = vadd.f32 %v1116_v34, %v1055_v14  ;;  %v617_v43 = vrot.slane %v570_v35, 1  ;;  %v619_v44 = vrot.slane %v571_v0, 1  ;;  %v708_v45 = vrot.slane %v661_v16, 2 }
  0x6e   : > { %v1160_v51 = vadd.f32 %v2375_v59, %v1145_v15  ;;  %v709_v33 = vrot.slane %v662_v39, 2  ;;  %v748_v46 = vmul.f32 %v2202_v10, %v2413_v49  ;;  %v711_v22 = vrot.slane %v663_v3, 2 }
  0x6f   : > { %v1161_v60 = vadd.f32 %v2375_v59, %v1146_v40  ;;  %v618_v61 = vsel %vm590_vm0, %v616_v38, %v617_v43  ;;  %v620_v27 = vsel %vm590_vm0, %v617_v43, %v619_v44  ;;  %v749_v58 = vmul.f32 %v2202_v10, %v2416_v41  ;;  %v2667_v38 = vld [vmem:[%s2200_s13 + $0xb8] sm:$0x3] }
  0x70   : > { %v1172_v25 = vmax.f32 %v1160_v51, 0.0  ;;  %v643_v48 = vadd.f32 %v618_v61, %v551_v55  ;;  %v644_v36 = vadd.f32 %v620_v27, %v552_v4  ;;  %v710_v53 = vsel %vm682_vm1, %v708_v45, %v709_v33  ;;  %v2648_v55 = vld [vmem:[%s2200_s13 + $0xa8] sm:$0xff]  ;;  %v512_v27 = vld [vmem:[%s462_s23] sm:$0xff] }
  0x71   : > { %v1173_v56 = vmax.f32 %v1161_v60, 0.0  ;;  %v712_v57 = vsel %vm682_vm1, %v709_v33, %v711_v22  ;;  %v778_v1 = vmul.f32 %v2204_v11, %v2413_v49  ;;  %v779_v2 = vmul.f32 %v2204_v11, %v2416_v41 }
  0x72   : > { %v735_v63 = vadd.f32 %v710_v53, %v643_v48  ;;  %v736_v18 = vadd.f32 %v712_v57, %v644_v36  ;;  %v780_v20 = vmul.f32 %v2204_v11, %v2429_v5  ;;  %v869_v19 = vmul.f32 %v2206_v12, %v2413_v49  ;;  %v513_v53 = vld [vmem:[%s462_s23 + $0x8] sm:$0xff] }
  0x73   : > { %v1181_v21 = vpack.c.bf16 %v1173_v56, %v1172_v25  ;;  %v824_v29 = vrot.slane %v778_v1, 1  ;;  %v870_v9 = vmul.f32 %v2206_v12, %v2416_v41  ;;  %v825_v30 = vrot.slane %v779_v2, 1  ;;  %v514_v1 = vld [vmem:[%s462_s23 + $0x10] sm:$0x3] }
  0x74   : > { %v760_v24 = vadd.f32 %v748_v46, %v735_v63  ;;  %v761_v28 = vadd.f32 %v749_v58, %v736_v18  ;;  %v827_v31 = vrot.slane %v780_v20, 1  ;;  %v871_v42 = vmul.f32 %v2206_v12, %v2429_v5 }
  0x75   : > { %1258 = vmatmul.bf16.gmra.mxu1 %v1181_v21  ;;  %v915_v4 = vrot.slane %v869_v19, 2  ;;  %v916_v32 = vrot.slane %v870_v9, 2  ;;  %v955_v14 = vmul.f32 %v2208_v13, %v2648_v55  ;;  %v826_v34 = vsel %vm590_vm0, %v824_v29, %v825_v30 }
  0x76   : > { %v828_v35 = vsel %vm590_vm0, %v825_v30, %v827_v31  ;;  %v956_v0 = vmul.f32 %v2208_v13, %v2651_v50  ;;  %v985_v15 = vmul.f32 %v2221_v17, %v2648_v55  ;;  %v851_v16 = vadd.f32 %v826_v34, %v760_v24 }
  0x77   : > { %v852_v39 = vadd.f32 %v828_v35, %v761_v28  ;;  %v917_v40 = vsel %vm682_vm1, %v915_v4, %v916_v32  ;;  %v918_v43 = vrot.slane %v871_v42, 2  ;;  %v986_v44 = vmul.f32 %v2221_v17, %v2651_v50 }
  0x78   : > { %v987_v3 = vmul.f32 %v2221_v17, %v2667_v38  ;;  %v1031_v51 = vrot.slane %v985_v15, 1  ;;  %v1076_v45 = vmul.f32 %v2243_v23, %v2648_v55  ;;  %v942_v46 = vadd.f32 %v917_v40, %v851_v16 }
  0x79   : > { %v919_v33 = vsel %vm682_vm1, %v916_v32, %v918_v43  ;;  %v1077_v60 = vmul.f32 %v2243_v23, %v2651_v50  ;;  %v1078_v61 = vmul.f32 %v2243_v23, %v2667_v38  ;;  %v1032_v25 = vrot.slane %v986_v44, 1 }
  0x7a   : > { %v943_v22 = vadd.f32 %v919_v33, %v852_v39  ;;  %v1034_v48 = vrot.slane %v987_v3, 1  ;;  %v1122_v36 = vrot.slane %v1076_v45, 2  ;;  %v967_v56 = vadd.f32 %v955_v14, %v942_v46 }
  0x7b   : > { %v1123_v57 = vrot.slane %v1077_v60, 2  ;;  %v1125_v58 = vrot.slane %v1078_v61, 2  ;;  %v515_v63 = vstv %s480_s11  ;;  %v1033_v2 = vsel %vm590_vm0, %v1031_v51, %v1032_v25  ;;  %s1737_s11 = sshll.u32 %s419_s17, 7 }
  0x7c   : > { %v968_v18 = vadd.f32 %v956_v0, %v943_v22  ;;  %v1035_v20 = vsel %vm590_vm0, %v1032_v25, %v1034_v48  ;;  %v2684_v21 = vmul.f32 %v515_v63, %v512_v27  ;;  %v1058_v29 = vadd.f32 %v1033_v2, %v967_v56  ;;  %s2886_s20 = scalar_lea.vmem [#allocation2], %s1737_s11 }
  0x7d   : > { %v1124_v19 = vsel %vm682_vm1, %v1122_v36, %v1123_v57  ;;  %v1126_v9 = vsel %vm682_vm1, %v1123_v57, %v1125_v58  ;;  %v2688_v24 = vmul.f32 %v515_v63, %v513_v53  ;;  %v2690_v30 = vmul.f32 %v515_v63, %v514_v1  ;;  %s1563_s16 = sshll.u32 %s2886_s20, 4  ;;  %s1564_s16 = int_to_ptr.vmem [resolvable:$true] %s1563_s16 }
  0x7e   : > { %v1059_v28 = vadd.f32 %v1035_v20, %v968_v18  ;;  %v1422_v31 = vmul.f32 %v2183_v6, %v2413_v49  ;;  %v1423_v42 = vmul.f32 %v2183_v6, %v2416_v41  ;;  %v1149_v4 = vadd.f32 %v1124_v19, %v1058_v29 }
  0x7f   : > { %v1424_v32 = vmul.f32 %v2185_v7, %v2413_v49  ;;  %v1425_v14 = vmul.f32 %v2185_v7, %v2416_v41  ;;  %v1426_v34 = vmul.f32 %v2185_v7, %v2429_v5  ;;  %v1439_v0 = vmul.f32 %v2187_v8, %v2413_v49 }
  0x80   : > { %v1150_v35 = vadd.f32 %v1126_v9, %v1059_v28  ;;  %v1440_v15 = vmul.f32 %v2187_v8, %v2416_v41  ;;  %v1441_v16 = vmul.f32 %v2187_v8, %v2429_v5  ;;  %v1164_v39 = vadd.f32 %v2375_v59, %v1149_v4 }
  0x81   : > { %v1430_v40 = vrot.slane %v1424_v32, 1  ;;  %v1431_v43 = vrot.slane %v1425_v14, 1  ;;  %v1433_v44 = vrot.slane %v1426_v34, 1  ;;  %v1445_v51 = vrot.slane %v1439_v0, 2 }
  0x82   : > { %v1165_v3 = vadd.f32 %v2375_v59, %v1150_v35  ;;  %v1446_v45 = vrot.slane %v1440_v15, 2  ;;  %v1448_v33 = vrot.slane %v1441_v16, 2  ;;  %v1176_v46 = vmax.f32 %v1164_v39, 0.0 }
  0x83   : > { %v1432_v60 = vsel %vm590_vm0, %v1430_v40, %v1431_v43  ;;  %v1434_v49 = vsel %vm590_vm0, %v1431_v43, %v1433_v44  ;;  %v1454_v41 = vmul.f32 %v2202_v10, %v2648_v55  ;;  %v1455_v48 = vmul.f32 %v2202_v10, %v2651_v50 }
  0x84   : > { %v1177_v61 = vmax.f32 %v1165_v3, 0.0  ;;  %v1437_v5 = vadd.f32 %v1432_v60, %v1422_v31  ;;  %v1438_v27 = vadd.f32 %v1434_v49, %v1423_v42  ;;  %v1447_v22 = vsel %vm682_vm1, %v1445_v51, %v1446_v45 }
  0x85   : > { %v1449_v25 = vsel %vm682_vm1, %v1446_v45, %v1448_v33  ;;  %v1458_v36 = vmul.f32 %v2204_v11, %v2648_v55  ;;  %v1459_v53 = vmul.f32 %v2204_v11, %v2651_v50  ;;  %v1460_v1 = vmul.f32 %v2204_v11, %v2667_v38 }
  0x86   : > { %v1183_v56 = vpack.c.bf16 %v1177_v61, %v1176_v46  ;;  %v1452_v57 = vadd.f32 %v1447_v22, %v1437_v5  ;;  %v1453_v58 = vadd.f32 %v1449_v25, %v1438_v27  ;;  %v1473_v2 = vmul.f32 %v2206_v12, %v2648_v55 }
  0x87   : > { %v1464_v63 = vrot.slane %v1458_v36, 1  ;;  %v1465_v18 = vrot.slane %v1459_v53, 1  ;;  %v1474_v20 = vmul.f32 %v2206_v12, %v2651_v50  ;;  %v1467_v9 = vrot.slane %v1460_v1, 1 }
  0x88   : > { %1268 = vmatmul.bf16.gmra.mxu3 %v1183_v56  ;;  %v1456_v29 = vadd.f32 %v1454_v41, %v1452_v57  ;;  %v1457_v19 = vadd.f32 %v1455_v48, %v1453_v58  ;;  %v1475_v28 = vmul.f32 %v2206_v12, %v2667_v38  ;;  %v1479_v42 = vrot.slane %v1473_v2, 2 }
  0x89   : > { %v1466_v31 = vsel %vm590_vm0, %v1464_v63, %v1465_v18  ;;  %v1480_v4 = vrot.slane %v1474_v20, 2  ;;  %v1488_v32 = vmul.f32 %v2208_v13, %v2684_v21  ;;  %v1468_v14 = vsel %vm590_vm0, %v1465_v18, %v1467_v9 }
  0x8a   : > { %v1471_v55 = vadd.f32 %v1466_v31, %v1456_v29  ;;  %v1482_v34 = vrot.slane %v1475_v28, 2  ;;  %v1489_v50 = vmul.f32 %v2208_v13, %v2688_v24  ;;  %v1472_v35 = vadd.f32 %v1468_v14, %v1457_v19 }
  0x8b   : > { %v1481_v0 = vsel %vm682_vm1, %v1479_v42, %v1480_v4  ;;  %v1492_v38 = vmul.f32 %v2221_v17, %v2684_v21  ;;  %v1493_v15 = vmul.f32 %v2221_v17, %v2688_v24  ;;  %v1494_v40 = vmul.f32 %v2221_v17, %v2690_v30 }
  0x8c   : > { %v1483_v16 = vsel %vm682_vm1, %v1480_v4, %v1482_v34  ;;  %v1486_v39 = vadd.f32 %v1481_v0, %v1471_v55  ;;  %v1507_v43 = vmul.f32 %v2243_v23, %v2684_v21  ;;  %v1508_v45 = vmul.f32 %v2243_v23, %v2688_v24 }
  0x8d   : > { %v1487_v44 = vadd.f32 %v1483_v16, %v1472_v35  ;;  %v1498_v3 = vrot.slane %v1492_v38, 1  ;;  %v1499_v51 = vrot.slane %v1493_v15, 1  ;;  %v1501_v46 = vrot.slane %v1494_v40, 1  ;;  %v1919_v16 = vld [vmem:[%s2200_s13 + $0x38] sm:$0xff] }
  0x8e   : > { %v1490_v33 = vadd.f32 %v1488_v32, %v1486_v39  ;;  %v1509_v60 = vmul.f32 %v2243_v23, %v2690_v30  ;;  %v1513_v49 = vrot.slane %v1507_v43, 2  ;;  %v1514_v5 = vrot.slane %v1508_v45, 2  ;;  %v1918_v32 = vld [vmem:[%s2200_s13 + $0x30] sm:$0xff]  ;;  %v1920_v45 = vld [vmem:[%s2200_s13 + $0x40] sm:$0x3] }
  0x8f   : > { %v1491_v41 = vadd.f32 %v1489_v50, %v1487_v44  ;;  %v1500_v61 = vsel %vm590_vm0, %v1498_v3, %v1499_v51  ;;  %v543_v27 = vmul.f32 %v2183_v6, %v2472_v26  ;;  %v1502_v21 = vsel %vm590_vm0, %v1499_v51, %v1501_v46 }
  0x90   : > { %v1505_v22 = vadd.f32 %v1500_v61, %v1490_v33  ;;  %v1516_v25 = vrot.slane %v1509_v60, 2  ;;  %v544_v24 = vmul.f32 %v2183_v6, %v2483_v37  ;;  %v1515_v36 = vsel %vm682_vm1, %v1513_v49, %v1514_v5 }
  0x91   : > { %v1506_v48 = vadd.f32 %v1502_v21, %v1491_v41  ;;  %v557_v30 = vmul.f32 %v2185_v7, %v2472_v26  ;;  %v558_v53 = vmul.f32 %v2185_v7, %v2483_v37  ;;  %v559_v58 = vmul.f32 %v2185_v7, %v2495_v52 }
  0x92   : > { %v1517_v56 = vsel %vm682_vm1, %v1514_v5, %v1516_v25  ;;  %v1520_v57 = vadd.f32 %v1515_v36, %v1505_v22  ;;  %v649_v1 = vmul.f32 %v2187_v8, %v2472_v26  ;;  %v650_v20 = vmul.f32 %v2187_v8, %v2483_v37 }
  0x93   : > { %v1521_v63 = vadd.f32 %v1517_v56, %v1506_v48  ;;  %v596_v18 = vrot.slane %v557_v30, 1  ;;  %v597_v2 = vrot.slane %v558_v53, 1  ;;  %v599_v19 = vrot.slane %v559_v58, 1  ;;  %v1921_v48 = vld [vmem:[%s2200_s13 + $0x48] sm:$0xff]  ;;  %v1922_v30 = vld [vmem:[%s2200_s13 + $0x50] sm:$0xff] }
  0x94   : > { %v1522_v29 = vadd.f32 %v2375_v59, %v1520_v57  ;;  %v651_v9 = vmul.f32 %v2187_v8, %v2495_v52  ;;  %v688_v28 = vrot.slane %v649_v1, 2  ;;  %v689_v4 = vrot.slane %v650_v20, 2  ;;  %v1923_v20 = vld [vmem:[%s2200_s13 + $0x58] sm:$0x3] }
  0x95   : > { %v1523_v31 = vadd.f32 %v2375_v59, %v1521_v63  ;;  %v598_v42 = vsel %vm590_vm0, %v596_v18, %v597_v2  ;;  %v740_v14 = vmul.f32 %v1918_v32, %v2202_v10  ;;  %v600_v34 = vsel %vm590_vm0, %v597_v2, %v599_v19 }
  0x96   : > { %v1524_v55 = vmax.f32 %v1522_v29, 0.0  ;;  %v635_v50 = vadd.f32 %v598_v42, %v543_v27  ;;  %v691_v35 = vrot.slane %v651_v9, 2  ;;  %v636_v38 = vadd.f32 %v600_v34, %v544_v24  ;;  %v506_v34 = vld [vmem:[%s445_s10 + $0x8] sm:$0xff] }
  0x97   : > { %v1525_v0 = vmax.f32 %v1523_v31, 0.0  ;;  %v690_v15 = vsel %vm682_vm1, %v688_v28, %v689_v4  ;;  %v741_v59 = vmul.f32 %v1919_v16, %v2202_v10  ;;  %v766_v43 = vmul.f32 %v1918_v32, %v2204_v11 }
  0x98   : > { %v692_v39 = vsel %vm682_vm1, %v689_v4, %v691_v35  ;;  %v727_v40 = vadd.f32 %v690_v15, %v635_v50  ;;  %v767_v44 = vmul.f32 %v1919_v16, %v2204_v11  ;;  %v768_v33 = vmul.f32 %v1920_v45, %v2204_v11 }
  0x99   : > { %v1526_v3 = vpack.c.bf16 %v1525_v0, %v1524_v55  ;;  %v728_v51 = vadd.f32 %v692_v39, %v636_v38  ;;  %v857_v46 = vmul.f32 %v1918_v32, %v2206_v12  ;;  %v804_v49 = vrot.slane %v766_v43, 1  ;;  %v505_v55 = vld [vmem:[%s445_s10] sm:$0xff]  ;;  %v507_v38 = vld [vmem:[%s445_s10 + $0x10] sm:$0x3]  ;;  %s1803_s10 = sshll.u32 %s1560_s9, 3  ;;  %s1945_s9 = scalar_lea.hbm %s2972_s7, 512 }
  0x9a   : > { %v752_v60 = vadd.f32 %v740_v14, %v727_v40  ;;  %v805_v41 = vrot.slane %v767_v44, 1  ;;  %v858_v61 = vmul.f32 %v1919_v16, %v2206_v12  ;;  %v807_v27 = vrot.slane %v768_v33, 1  ;;  %s1562_s18 = scalar_lea.hbm %s2972_s7, %s1803_s10 }
  0x9b   : > { %1535 = vmatmul.bf16.vlgmr.msra.gmra.mxu2 %v1526_v3  ;;  %v753_v5 = vadd.f32 %v741_v59, %v728_v51  ;;  %v859_v21 = vmul.f32 %v1920_v45, %v2206_v12  ;;  %v895_v22 = vrot.slane %v857_v46, 2  ;;  %v947_v36 = vmul.f32 %v1921_v48, %v2208_v13  ;;  %s1565_s23 = sshll.u32 %s1562_s18, 4  ;;  %s1566_s23 = int_to_ptr.hbm [resolvable:$true] %s1565_s23 }
  0x9c   : > { %v806_v25 = vsel %vm590_vm0, %v804_v49, %v805_v41  ;;  %v896_v24 = vrot.slane %v858_v61, 2  ;;  %v948_v53 = vmul.f32 %v1922_v30, %v2208_v13  ;;  %v808_v56 = vsel %vm590_vm0, %v805_v41, %v807_v27  ;;  %s1939_s28 = sshra.s32 %s1566_s23, 4  ;;  %s1940_s28 = int_to_ptr.hbm [resolvable:$true] %s1939_s28 }
  0x9d   : > { %v843_v57 = vadd.f32 %v806_v25, %v752_v60  ;;  %v898_v58 = vrot.slane %v859_v21, 2  ;;  %v973_v1 = vmul.f32 %v1921_v48, %v2221_v17  ;;  %v844_v63 = vadd.f32 %v808_v56, %v753_v5  ;;  %s1941_s11 = scalar_lea.hbm %s1940_s28, 128  ;;  %p1946_p10 = scmp.lt.s32.totalorder %s1940_s28, %s2972_s7 }
  0x9e   : > { %v897_v18 = vsel %vm682_vm1, %v895_v22, %v896_v24  ;;  %v974_v2 = vmul.f32 %v1922_v30, %v2221_v17  ;;  %v975_v29 = vmul.f32 %v1923_v20, %v2221_v17  ;;  %v1064_v31 = vmul.f32 %v1921_v48, %v2243_v23  ;;  %p1942_p6 = scmp.ne.s32.totalorder %s1940_s28, %s1941_s11  ;;  %p1947_p11 = scmp.lt.s32.totalorder %s1945_s9, %s1941_s11 }
  0x9f   : > { %v899_v19 = vsel %vm682_vm1, %v896_v24, %v898_v58  ;;  %v934_v9 = vadd.f32 %v897_v18, %v843_v57  ;;  %v1011_v28 = vrot.slane %v973_v1, 1  ;;  %v1065_v14 = vmul.f32 %v1922_v30, %v2243_v23  ;;  %v2826_v24 = vld [vmem:[%s2969_s4] ss:$0 sm:$0xff] }
  0xa0   : > { %v935_v42 = vadd.f32 %v899_v19, %v844_v63  ;;  %v1012_v4 = vrot.slane %v974_v2, 1  ;;  %v1014_v32 = vrot.slane %v975_v29, 1  ;;  %v1066_v35 = vmul.f32 %v1923_v20, %v2243_v23  ;;  %p1943_p7 = pnand %p1942_p6, %p2114_p3  ;;  %p1948_p12 = por %p1947_p11, %p1946_p10 }
  0xa1   : > { %v959_v50 = vadd.f32 %v947_v36, %v934_v9  ;;  %v1102_v0 = vrot.slane %v1064_v31, 2  ;;  %v508_v15 = vstv %s477_s21  ;;  %v1103_v40 = vrot.slane %v1065_v14, 2 }
  0xa2   : > { %v960_v16 = vadd.f32 %v948_v53, %v935_v42  ;;  %v1013_v59 = vsel %vm590_vm0, %v1011_v28, %v1012_v4  ;;  %v1015_v39 = vsel %vm590_vm0, %v1012_v4, %v1014_v32  ;;  %v1105_v44 = vrot.slane %v1066_v35, 2  ;;  %p1944_p9 = pneg %p1943_p7 }
  0xa3   : > { %v1050_v43 = vadd.f32 %v1013_v59, %v959_v50  ;;  %v509_v3 = vmul.f32 %v508_v15, %v505_v55  ;;  %v510_v51 = vmul.f32 %v508_v15, %v506_v34  ;;  %v1104_v33 = vsel %vm682_vm1, %v1102_v0, %v1103_v40 }
  0xa4   : > { %v1051_v45 = vadd.f32 %v1015_v39, %v960_v16  ;;  %v511_v46 = vmul.f32 %v508_v15, %v507_v38  ;;  %v1331_v60 = vmul.f32 %v2202_v10, %v2451_v47  ;;  %v1106_v49 = vsel %vm682_vm1, %v1103_v40, %v1105_v44  ;;  %p1949_p13 = pnand %p1948_p12, %p1944_p9 }
  0xa5   : > { %v1141_v41 = vadd.f32 %v1104_v33, %v1050_v43  ;;  %v1299_v61 = vmul.f32 %v2183_v6, %v509_v3  ;;  %v1300_v5 = vmul.f32 %v2183_v6, %v510_v51  ;;  %v1301_v21 = vmul.f32 %v2185_v7, %v509_v3 }
  0xa6   : > { %v1142_v27 = vadd.f32 %v1106_v49, %v1051_v45  ;;  %v1302_v22 = vmul.f32 %v2185_v7, %v510_v51  ;;  %v1303_v25 = vmul.f32 %v2185_v7, %v511_v46  ;;  %v1316_v36 = vmul.f32 %v2187_v8, %v509_v3 }
  0xa7   : > { %v1156_v48 = vadd.f32 %v2826_v24, %v1141_v41  ;;  %v1317_v30 = vmul.f32 %v2187_v8, %v510_v51  ;;  %v1318_v6 = vmul.f32 %v2187_v8, %v511_v46  ;;  %v1307_v56 = vrot.slane %v1301_v21, 1 }
  0xa8   : > { %v1157_v53 = vadd.f32 %v2826_v24, %v1142_v27  ;;  %v1308_v57 = vrot.slane %v1302_v22, 1  ;;  %v1310_v58 = vrot.slane %v1303_v25, 1  ;;  %v1322_v7 = vrot.slane %v1316_v36, 2 }
  0xa9   : > { %v1168_v1 = vmax.f32 %v1156_v48, 0.0  ;;  %v1323_v63 = vrot.slane %v1317_v30, 2  ;;  %v1325_v18 = vrot.slane %v1318_v6, 2  ;;  %v1332_v19 = vmul.f32 %v2202_v10, %v2456_v54 }
  0xaa   : > { %v1169_v2 = vmax.f32 %v1157_v53, 0.0  ;;  %v1309_v20 = vsel %vm590_vm0, %v1307_v56, %v1308_v57  ;;  %v1311_v29 = vsel %vm590_vm0, %v1308_v57, %v1310_v58  ;;  %v1335_v4 = vmul.f32 %v2204_v11, %v2451_v47  ;;  %v2878_v56 = vld [vmem:[%s2971_s6] ss:$0 sm:$0xff] }
  0xab   : > { %v1314_v9 = vadd.f32 %v1309_v20, %v1299_v61  ;;  %v1315_v28 = vadd.f32 %v1311_v29, %v1300_v5  ;;  %v1324_v8 = vsel %vm682_vm1, %v1322_v7, %v1323_v63  ;;  %v1326_v31 = vsel %vm682_vm1, %v1323_v63, %v1325_v18 }
  0xac   : > { %v1179_v42 = vpack.c.bf16 %v1169_v2, %v1168_v1  ;;  %v1336_v32 = vmul.f32 %v2204_v11, %v2456_v54  ;;  %v1337_v14 = vmul.f32 %v2204_v11, %v2463_v62  ;;  %v1350_v10 = vmul.f32 %v2206_v12, %v2451_v47 }
  0xad   : > { %v1329_v55 = vadd.f32 %v1324_v8, %v1314_v9  ;;  %v1330_v34 = vadd.f32 %v1326_v31, %v1315_v28  ;;  %v1351_v50 = vmul.f32 %v2206_v12, %v2456_v54  ;;  %v1341_v35 = vrot.slane %v1335_v4, 1 }
  0xae   : > { %1248 = vmatmul.bf16.gmra.mxu0 %v1179_v42  ;;  %v1342_v0 = vrot.slane %v1336_v32, 1  ;;  %v1344_v38 = vrot.slane %v1337_v14, 1  ;;  %v1352_v15 = vmul.f32 %v2206_v12, %v2463_v62  ;;  %v1356_v39 = vrot.slane %v1350_v10, 2 }
  0xaf   : > { %v1333_v16 = vadd.f32 %v1331_v60, %v1329_v55  ;;  %v1334_v59 = vadd.f32 %v1332_v19, %v1330_v34  ;;  %v1357_v40 = vrot.slane %v1351_v50, 2  ;;  %v1365_v47 = vmul.f32 %v2208_v13, %v2472_v26 }
  0xb0   : > { %v1343_v11 = vsel %vm590_vm0, %v1341_v35, %v1342_v0  ;;  %v1345_v43 = vsel %vm590_vm0, %v1342_v0, %v1344_v38  ;;  %v1359_v44 = vrot.slane %v1352_v15, 2  ;;  %v1366_v45 = vmul.f32 %v2208_v13, %v2483_v37 }
  0xb1   : > { %v1348_v54 = vadd.f32 %v1343_v11, %v1333_v16  ;;  %v1349_v3 = vadd.f32 %v1345_v43, %v1334_v59  ;;  %v1358_v51 = vsel %vm682_vm1, %v1356_v39, %v1357_v40  ;;  %v1369_v62 = vmul.f32 %v2221_v17, %v2472_v26 }
  0xb2   : > { %v1360_v12 = vsel %vm682_vm1, %v1357_v40, %v1359_v44  ;;  %v1370_v33 = vmul.f32 %v2221_v17, %v2483_v37  ;;  %v1371_v46 = vmul.f32 %v2221_v17, %v2495_v52  ;;  %v1384_v41 = vmul.f32 %v2243_v23, %v2472_v26 }
  0xb3   : > { %v1363_v60 = vadd.f32 %v1358_v51, %v1348_v54  ;;  %v1364_v49 = vadd.f32 %v1360_v12, %v1349_v3  ;;  %v1385_v13 = vmul.f32 %v2243_v23, %v2483_v37  ;;  %v1375_v61 = vrot.slane %v1369_v62, 1 }
  0xb4   : > { %v1376_v5 = vrot.slane %v1370_v33, 1  ;;  %v1378_v27 = vrot.slane %v1371_v46, 1  ;;  %v1386_v21 = vmul.f32 %v2243_v23, %v2495_v52  ;;  %v1390_v48 = vrot.slane %v1384_v41, 2 }
  0xb5   : > { %v1367_v22 = vadd.f32 %v1365_v47, %v1363_v60  ;;  %v1368_v25 = vadd.f32 %v1366_v45, %v1364_v49  ;;  %v1391_v17 = vrot.slane %v1385_v13, 2 }
  0xb6   : > { %v1377_v36 = vsel %vm590_vm0, %v1375_v61, %v1376_v5  ;;  %v1379_v30 = vsel %vm590_vm0, %v1376_v5, %v1378_v27  ;;  %v1393_v6 = vrot.slane %v1386_v21, 2 }
  0xb7   : > { %v1382_v26 = vadd.f32 %v1377_v36, %v1367_v22  ;;  %v1383_v53 = vadd.f32 %v1379_v30, %v1368_v25  ;;  %v1392_v37 = vsel %vm682_vm1, %v1390_v48, %v1391_v17 }
  0xb8   : > { %v1394_v23 = vsel %vm682_vm1, %v1391_v17, %v1393_v6 }
  0xb9   : > { %v1397_v52 = vadd.f32 %v1392_v37, %v1382_v26  ;;  %v1398_v57 = vadd.f32 %v1394_v23, %v1383_v53 }
  0xbb   : > { %v1254_v58 = vpop.f32.mrf.mxu1  ;;  %v1399_v1 = vadd.f32 %v2826_v24, %v1397_v52  ;;  %v1400_v7 = vadd.f32 %v2826_v24, %v1398_v57 }
  0xbc   : > { %v1255_v63 = vadd.f32 %v2878_v56, %v1254_v58 }
  0xbd   : > { %v1401_v18 = vmax.f32 %v1399_v1, 0.0  ;;  %v1402_v2 = vmax.f32 %v1400_v7, 0.0 }
  0xbe   : > { %v1278_v20 = vmax.f32 %v1255_v63, 0.0 }
  0xbf   : > { %v1403_v29 = vpack.c.bf16 %v1402_v2, %v1401_v18 }
  0xc0   : > { %1789 = vst [vmem:[%s2886_s20 + $0x30] sm:$0xff] %v1278_v20 }
  0xc1   : > { %1412 = vmatmul.bf16.vlgmr.msrb.gmra.mxu1 %v1403_v29 }
  0xc3   : > { %v1256_v19 = vpop.f32.mrf.mxu1 }
  0xc4   : > { %v1257_v9 = vadd.f32 %v2878_v56, %v1256_v19 }
  0xc6   : > { %v1279_v28 = vmax.f32 %v1257_v9, 0.0 }
  0xc8   : > { %1790 = vst [vmem:[%s2886_s20 + $0x38] sm:$0xff] %v1279_v28 }
  0xd2   : > { %v1264_v24 = vpop.f32.mrf.mxu3 }
  0xd3   : > { %v1265_v8 = vadd.f32 %v2878_v56, %v1264_v24 }
  0xd5   : > { %v1282_v31 = vmax.f32 %v1265_v8, 0.0 }
  0xd7   : > { %1793 = vst [vmem:[%s2886_s20 + $0x50] sm:$0xff] %v1282_v31 }
  0xda   : > { %v1266_v42 = vpop.f32.mrf.mxu3 }
  0xdb   : > { %v1267_v4 = vadd.f32 %v2878_v56, %v1266_v42 }
  0xdd   : > { %v1283_v32 = vmax.f32 %v1267_v4, 0.0 }
  0xdf   : > { %v1244_v14 = vpop.f32.mrf.mxu0  ;;  %1794 = vst [vmem:[%s2886_s20 + $0x58] sm:$0xff] %v1283_v32 }
  0xe0   : > { %v1245_v55 = vadd.f32 %v2878_v56, %v1244_v14 }
  0xe2   : > { %v1274_v34 = vmax.f32 %v1245_v55, 0.0 }
  0xe4   : > { %1785 = vst [vmem:[%s2886_s20 + $0x10] sm:$0xff] %v1274_v34 }
  0xe7   : > { %v1246_v10 = vpop.f32.mrf.mxu0 }
  0xe8   : > { %v1247_v50 = vadd.f32 %v2878_v56, %v1246_v10 }
  0xea   : > { %v1275_v35 = vmax.f32 %v1247_v50, 0.0 }
  0xec   : > { %1786 = vst [vmem:[%s2886_s20 + $0x18] sm:$0xff] %v1275_v35 }
  0xf2   : > { %v1259_v0 = vpop.f32.mrf.mxu1 }
  0xf3   : > { %v1260_v38 = vadd.f32 %v2878_v56, %v1259_v0 }
  0xf5   : > { %v1280_v15 = vmax.f32 %v1260_v38, 0.0 }
  0xf7   : > { %1791 = vst [vmem:[%s2886_s20 + $0x40] sm:$0xff] %v1280_v15 }
  0xfa   : > { %v1261_v16 = vpop.f32.mrf.mxu1 }
  0xfb   : > { %v1262_v39 = vadd.f32 %v2878_v56, %v1261_v16 }
  0xfd   : > { %v1281_v11 = vmax.f32 %v1262_v39, 0.0 }
  0xff   : > { %1792 = vst [vmem:[%s2886_s20 + $0x48] sm:$0xff] %v1281_v11 }
 0x10b   : > { %v1269_v59 = vpop.f32.mrf.mxu3 }
 0x10c   : > { %v1270_v40 = vadd.f32 %v2878_v56, %v1269_v59 }
 0x10e   : > { %v1284_v43 = vmax.f32 %v1270_v40, 0.0 }
 0x110   : > { %1795 = vst [vmem:[%s2886_s20 + $0x60] sm:$0xff] %v1284_v43 }
 0x113   : > { %v1271_v44 = vpop.f32.mrf.mxu3 }
 0x114   : > { %v1272_v47 = vadd.f32 %v2878_v56, %v1271_v44 }
 0x116   : > { %v1285_v54 = vmax.f32 %v1272_v47, 0.0 }
 0x118   : > { %1796 = vst [vmem:[%s2886_s20 + $0x68] sm:$0xff] %v1285_v54 }
 0x11e   : > { %v1536_v3 = vpop.f32.mrf.mxu2 }
 0x11f   : > { %v1537_v51 = vadd.f32 %v2878_v56, %v1536_v3 }
 0x121   : > { %v1541_v45 = vmax.f32 %v1537_v51, 0.0 }
 0x123   : > { %1797 = vst [vmem:[%s2886_s20 + $0x70] sm:$0xff] %v1541_v45 }
 0x126   : > { %v1538_v12 = vpop.f32.mrf.mxu2 }
 0x127   : > { %v1539_v62 = vadd.f32 %v2878_v56, %v1538_v12 }
 0x129   : > { %v1542_v33 = vmax.f32 %v1539_v62, 0.0 }
 0x12b   : > { %v1249_v46 = vpop.f32.mrf.mxu0  ;;  %1798 = vst [vmem:[%s2886_s20 + $0x78] sm:$0xff] %v1542_v33 }
 0x12c   : > { %v1250_v60 = vadd.f32 %v2878_v56, %v1249_v46 }
 0x12e   : > { %v1276_v49 = vmax.f32 %v1250_v60, 0.0 }
 0x130   : > { %1787 = vst [vmem:[%s2886_s20 + $0x20] sm:$0xff] %v1276_v49 }
 0x133   : > { %v1251_v41 = vpop.f32.mrf.mxu0 }
 0x134   : > { %v1252_v13 = vadd.f32 %v2878_v56, %v1251_v41 }
 0x136   : > { %v1277_v61 = vmax.f32 %v1252_v13, 0.0 }
 0x138   : > { %1788 = vst [vmem:[%s2886_s20 + $0x28] sm:$0xff] %v1277_v61 }
 0x13e   : > { %v1413_v5 = vpop.f32.mrf.mxu1 }
 0x13f   : > { %v1414_v27 = vadd.f32 %v2878_v56, %v1413_v5 }
 0x141   : > { %v1418_v21 = vmax.f32 %v1414_v27, 0.0 }
 0x143   : > { %1420 = vst [vmem:[%s2886_s20] sm:$0xff] %v1418_v21 }
 0x146   : > { %v1415_v22 = vpop.f32.mrf.mxu1 }
 0x147   : > { %v1416_v25 = vadd.f32 %v2878_v56, %v1415_v22 }
 0x149   : > { %v1419_v48 = vmax.f32 %v1416_v25, 0.0 }
 0x14b   : > { %1421 = vst [vmem:[%s2886_s20 + $0x8] sm:$0xff] %v1419_v48 }
 0x14c   : > { %1952 = shalt.err (!%p1949_p13)
}
 0x14d   : > { %s2021_s17 = smov 128   ;;  %s2022_s20 = smov 8  }
 0x14e   : > { %1843 = dma.vmem_to_hbm [thread:$0]  (%p2114_p3), %s1564_s16, 2048, %s1566_s23, %s1547_s27, %s2021_s17, %s2021_s17, %s2022_s20  }
 0x14f PF: > { %p1849_p0 = scmp.ge.s32.totalorder %s2019_s8, 2  ;;  %s1580_s13 = sand.u32 1, %s1991_s24  }
 0x150   : > { %s1581_s18 = scalar_lea.sflag [#allocation3], %s1580_s13 }
 0x151   : > { %p1846_p1 = pnand %p1849_p0, %p2123_p8 }
 0x153   : > { %p1847_p2 = pneg %p1846_p1 }
 0x155   : > { %1986 = dma.done.wait (%p1847_p2), %s1581_s18, 2048  }
 0x156   : > { %1988 = vsyncadd (%p1847_p2), %s1581_s18, 4294965248  ;;  %s20_s8 = sadd.s32 1, %s2019_s8   ;;  %s2981_s14 = sld [smem:[#allocation5_spill]] }
 0x157   : > { %p17_p4 = scmp.ge.s32.totalorder %s20_s8, 6   ;;  %s2982_s16 = sld [smem:[#allocation6_spill]] }
 0x158   : > { %s2983_s24 = smov %s1995_s25  ;;  %s2984_s25 = smov %s1999_s26 }
 0x159   : > { %s2985_s26 = smov %s2132_s19  ;;  %s2986_s27 = smov %s2011_s29 }
 0x15a   : > { %s2987_s28 = smov %s2015_s30  ;;  %19 = sbr.rel (!%p17_p4) target bundleno = 5 (0x5), region = 97 }
 0x15c   : > { %s2988_s29 = smov %s2981_s14 }
 0x15d   : > { %s2989_s30 = smov %s2982_s16 }
 0x15f   :  { %1587 = vsyncpa [#allocation3], 1 }
 0x160   :  { %1589 = vsyncpa [#allocation3 + $0x1], 1 }

</bundles_post_ra>
